<compile_context>
chip_gen: v5e
topology: v5e:2x2
jax: 0.10.0
libtpu: 0.0.40
codegen_flags: <defaults>
</compile_context>

<pallas_src>
import numpy as np

import jax
import jax.numpy as jnp
from jax.experimental import pallas as pl
from jax.experimental.pallas import tpu as pltpu


def _round_up(a, b):
    return (a + b - 1) // b * b


# ----------------------------- Pallas kernel ------------------------------ #
def deepant_kernel(x_ref, k1_ref, b1_ref, k2_ref, b2_ref,
                   w3_ref, b3_ref, w4_ref, b4_ref, out_ref):
    """One block of B samples; 4 bf16 MXU matmuls + f32 VPU elementwise."""
    f32 = jnp.float32
    bf16 = jnp.bfloat16
    c1 = b1_ref.shape[1]            # lane-aligned padded conv1 output width
    c2 = b2_ref.shape[1]            # lane-aligned padded conv2 output width

    # convblock1: Conv1d(1->32,k=3,valid)+ReLU+MaxPool1d(2).
    # One matmul against the concatenated [even | odd] band matrix, then
    # max(relu(even), relu(odd)) == pool(relu(conv)).  Split point c1 is a
    # multiple of 128, so the slices/max are pure lane-aligned VPU ops.
    x = x_ref[...].astype(bf16)                                     # (B, L)
    h1 = jnp.dot(x, k1_ref[...], preferred_element_type=f32)        # (B, 2*c1)
    b1 = b1_ref[...]
    p1 = jnp.maximum(jnp.maximum(h1[:, :c1] + b1, 0.0),
                     jnp.maximum(h1[:, c1:] + b1, 0.0))             # (B, c1) f32

    # convblock2: Conv1d(32->32,k=3,valid)+ReLU+MaxPool1d(2), same fusion.
    h2 = jnp.dot(p1.astype(bf16), k2_ref[...],
                 preferred_element_type=f32)                        # (B, 2*c2)
    b2 = b2_ref[...]
    p2 = jnp.maximum(jnp.maximum(h2[:, :c2] + b2, 0.0),
                     jnp.maximum(h2[:, c2:] + b2, 0.0))             # (B, c2) f32

    # denseblock: Linear(flat->40) + ReLU  (Dropout(p=0.25) = identity in eval mode)
    h3 = jnp.maximum(
        jnp.dot(p2.astype(bf16), w3_ref[...],
                preferred_element_type=f32) + b3_ref[...], 0.0)     # (B, 40)

    # out: Linear(40 -> p_w), one block-level store.
    out_ref[...] = (jnp.dot(h3.astype(bf16), w4_ref[...],
                            preferred_element_type=f32)
                    + b4_ref[...]).astype(out_ref.dtype)            # (B, p_w)


# --------------------------- parameter preparation ------------------------- #
def _pooled_conv_matrix(w, L_in, n_out, parity):
    """Band matrix K with  (act @ K)[:, t*Cout + co] = conv_valid(act, w) at time 2t+parity.

    act columns are indexed (t_in * Cin + ci); w has shape (Cout, Cin, Ktap).
    Returns (L_in*Cin, n_out*Cout) float32.
    """
    Cout, Cin, Ktap = w.shape
    tin = np.arange(L_in)[:, None]                     # (L_in, 1)
    tp = np.arange(n_out)[None, :]                     # (1, n_out)
    j = tin - (2 * tp + parity)                        # tap index, (L_in, n_out)
    valid = (j >= 0) & (j < Ktap)
    jc = np.clip(j, 0, Ktap - 1)

    wr = jnp.transpose(w, (2, 1, 0))                   # (Ktap, Cin, Cout)
    gathered = wr[jc]                                  # (L_in, n_out, Cin, Cout)
    band = jnp.where(jnp.asarray(valid)[:, :, None, None], gathered, 0.0)
    band = jnp.transpose(band, (0, 2, 1, 3))           # (L_in, Cin, n_out, Cout)
    return band.reshape(L_in * Cin, n_out * Cout).astype(jnp.float32)


def _pad_to(a, rows, cols):
    return jnp.pad(a, ((0, rows - a.shape[0]), (0, cols - a.shape[1])))


def deepant_prepare(params, seq_len):
    """One-time re-layout of the PyTorch parameters into kernel operands (bf16 MXU side)."""
    w1, b1, w2, b2, W3, b3, W4, b4 = params
    bf16 = jnp.bfloat16
    L = seq_len
    L1 = L - 2
    L1p = L1 // 2
    L2 = L1p - 2
    L2p = L2 // 2
    assert L2p >= 1, "seq_len too small for DeepAnt (need seq_len >= 10)"
    C = w1.shape[0]                                    # 32
    n_hidden = W3.shape[0]                             # 40
    p_w = W4.shape[0]
    assert W3.shape[1] == C * L2p

    cols1 = L1p * C                                    # 480 for seq_len=32
    cols2 = L2p * C                                    # 192 for seq_len=32
    c1 = _round_up(cols1, 128)                         # 512 (lane aligned)
    c2 = _round_up(cols2, 128)                         # 256 (lane aligned)

    # Conv1 even/odd bands, padded to c1 columns and concatenated -> (L, 2*c1).
    k1e = _pad_to(_pooled_conv_matrix(w1, L, L1p, 0), L, c1)
    k1o = _pad_to(_pooled_conv_matrix(w1, L, L1p, 1), L, c1)
    k1 = jnp.concatenate([k1e, k1o], axis=1).astype(bf16)
    b1r = _pad_to(jnp.tile(b1, L1p).reshape(1, cols1), 1, c1).astype(jnp.float32)

    # Conv2 even/odd bands, padded to (c1, c2) and concatenated -> (c1, 2*c2).
    # The zero-padded rows line up with the (always-zero) padded p1 columns.
    k2e = _pad_to(_pooled_conv_matrix(w2, L1p, L2p, 0), c1, c2)
    k2o = _pad_to(_pooled_conv_matrix(w2, L1p, L2p, 1), c1, c2)
    k2 = jnp.concatenate([k2e, k2o], axis=1).astype(bf16)
    b2r = _pad_to(jnp.tile(b2, L2p).reshape(1, cols2), 1, c2).astype(jnp.float32)

    # PyTorch flatten is channel-major (flat idx = c*L2p + t); our p2 columns are t*C + c.
    w3p = jnp.transpose(W3.reshape(n_hidden, C, L2p), (2, 1, 0)).reshape(cols2, n_hidden)
    w3p = _pad_to(w3p, c2, n_hidden).astype(bf16)      # zero rows meet zero p2 columns
    b3r = b3.reshape(1, n_hidden).astype(jnp.float32)
    w4p = W4.T.astype(bf16)                            # (40, p_w)
    b4r = b4.reshape(1, p_w).astype(jnp.float32)
    return (k1, b1r, k2, b2r, w3p, b3r, w4p, b4r)


# ------------------------------- forward ----------------------------------- #
@jax.jit
def deepant_forward(x, prep):
    """x: (N, 1, L) float32 (PyTorch NCW).  prep: output of deepant_prepare."""
    k1, b1r, k2, b2r, w3p, b3r, w4p, b4r = prep
    N, cin, L = x.shape
    assert cin == 1 and k1.shape[0] == L
    p_w = w4p.shape[1]

    x2 = x.reshape(N, L)                               # metadata-only (contiguous)

    # Balanced, padding-aware batch blocking:
    #  * blocks of at most ~512 samples (amortizes per-step overhead on v5e/v6e),
    #  * at least 2 "parallel" blocks once N >= 16 so v7x can use both TensorCores,
    #  * B_block sized from cdiv(N, num_blocks) so padding is <= 7 rows total.
    MAX_BLOCK = 512
    num_blocks = max(1, pl.cdiv(N, MAX_BLOCK))
    if N >= 16:
        num_blocks = max(num_blocks, 2)
    B_block = _round_up(pl.cdiv(N, num_blocks), 8)
    Np = num_blocks * B_block
    if Np != N:
        x2 = jnp.pad(x2, ((0, Np - N), (0, 0)))

    weights = [k1, b1r, k2, b2r, w3p, b3r, w4p, b4r]
    # Constant index_maps -> weights stay resident in VMEM across grid steps.
    weight_specs = [pl.BlockSpec(w.shape, lambda i, nd=w.ndim: (0,) * nd)
                    for w in weights]

    out = pl.pallas_call(
        deepant_kernel,
        out_shape=jax.ShapeDtypeStruct((Np, p_w), jnp.float32),
        grid=(num_blocks,),
        in_specs=[pl.BlockSpec((B_block, L), lambda i: (i, 0))] + weight_specs,
        out_specs=pl.BlockSpec((B_block, p_w), lambda i: (i, 0)),
        compiler_params=pltpu.CompilerParams(dimension_semantics=("parallel",)),
    )(x2, *weights)
    return out[:N]                                     # (N, p_w)


# ---------------------------- pure-JAX reference --------------------------- #
def _conv1d_valid(x, w, b):
    # x: (N, Cin, L), w: (Cout, Cin, K), b: (Cout,)
    K = w.shape[2]
    Lout = x.shape[2] - K + 1
    y = jnp.zeros((x.shape[0], w.shape[0], Lout), jnp.float32)
    for j in range(K):
        y = y + jnp.einsum('ncl,oc->nol', x[:, :, j:j + Lout], w[:, :, j])
    return y + b[None, :, None]


def _maxpool1d_k2(x):
    N, C, L = x.shape
    Lp = L // 2
    return x[:, :, :2 * Lp].reshape(N, C, Lp, 2).max(axis=-1)


def deepant_reference(x, params):
    w1, b1, w2, b2, W3, b3, W4, b4 = params
    h = _maxpool1d_k2(jnp.maximum(_conv1d_valid(x, w1, b1), 0.0))
    h = _maxpool1d_k2(jnp.maximum(_conv1d_valid(h, w2, b2), 0.0))
    flat = h.reshape(h.shape[0], -1)                   # PyTorch flatten (channel-major)
    h = jnp.maximum(flat @ W3.T + b3, 0.0)             # Dropout = identity (eval)
    return h @ W4.T + b4


# ---------------------------------- main ----------------------------------- #
if __name__ == "__main__":
    seq_len = 32
    p_w = 8
    batch = 4

    L1 = seq_len - 2
    L1p = L1 // 2
    L2 = L1p - 2
    L2p = L2 // 2
    flat_dim = 32 * L2p                                # 192 for seq_len=32

    key = jax.random.PRNGKey(0)
    keys = jax.random.split(key, 10)

    # Deterministic synthetic parameters (shapes match nn.Module.__init__).
    w1 = 0.1 * jax.random.normal(keys[0], (32, 1, 3), jnp.float32)
    b1 = 0.1 * jax.random.normal(keys[1], (32,), jnp.float32)
    w2 = 0.1 * jax.random.normal(keys[2], (32, 32, 3), jnp.float32)
    b2 = 0.1 * jax.random.normal(keys[3], (32,), jnp.float32)
    W3 = 0.1 * jax.random.normal(keys[4], (40, flat_dim), jnp.float32)
    b3 = 0.1 * jax.random.normal(keys[5], (40,), jnp.float32)
    W4 = 0.1 * jax.random.normal(keys[6], (p_w, 40), jnp.float32)
    b4 = 0.1 * jax.random.normal(keys[7], (p_w,), jnp.float32)
    params = (w1, b1, w2, b2, W3, b3, W4, b4)

    prep = deepant_prepare(params, seq_len)

    # Tolerances account for bf16 MXU operands (f32 accumulation) vs. f32 reference.
    RTOL = ATOL = 3e-2

    # Small batch (single grid block).
    x = jax.random.normal(keys[8], (batch, 1, seq_len), jnp.float32)
    y_kernel = jax.block_until_ready(deepant_forward(x, prep))
    y_ref = jax.block_until_ready(deepant_reference(x, params))
    assert y_kernel.shape == (batch, p_w)
    assert jnp.allclose(y_kernel, y_ref, rtol=RTOL, atol=ATOL), (
        f"mismatch (small batch): max abs err = {jnp.max(jnp.abs(y_kernel - y_ref))}")

    # Larger ragged batch: exercises multi-block grid + (minimal) batch padding.
    big = 300
    xb = jax.random.normal(keys[9], (big, 1, seq_len), jnp.float32)
    yb_kernel = jax.block_until_ready(deepant_forward(xb, prep))
    yb_ref = jax.block_until_ready(deepant_reference(xb, params))
    assert yb_kernel.shape == (big, p_w)
    assert jnp.allclose(yb_kernel, yb_ref, rtol=RTOL, atol=ATOL), (
        f"mismatch (big batch): max abs err = {jnp.max(jnp.abs(yb_kernel - yb_ref))}")

    print("KERNEL_OK")
</pallas_src>

<mosaic_0001>
module attributes {stable_mosaic.version = 11 : i64} {
  func.func @deepant_kernel(%arg0: i32, %arg1: memref<8x32xf32, #tpu.memory_space<vmem>>, %arg2: memref<32x1024xbf16, #tpu.memory_space<vmem>>, %arg3: memref<1x512xf32, #tpu.memory_space<vmem>>, %arg4: memref<512x512xbf16, #tpu.memory_space<vmem>>, %arg5: memref<1x256xf32, #tpu.memory_space<vmem>>, %arg6: memref<256x40xbf16, #tpu.memory_space<vmem>>, %arg7: memref<1x40xf32, #tpu.memory_space<vmem>>, %arg8: memref<40x8xbf16, #tpu.memory_space<vmem>>, %arg9: memref<1x8xf32, #tpu.memory_space<vmem>>, %arg10: memref<8x8xf32, #tpu.memory_space<vmem>>) attributes {dimension_semantics = [#tpu.dimension_semantics<parallel>], iteration_bounds = array<i64: 1>, scalar_prefetch = 0 : i64, scratch_operands = 0 : i64, tpu.core_type = #tpu.core_type<tc>, window_params = [{transform_indices = @transform_0, window_bounds = array<i64: 8, 32>}, {pipeline_mode = #tpu.pipeline_mode<synchronous>, transform_indices = @transform_1, window_bounds = array<i64: 32, 1024>}, {pipeline_mode = #tpu.pipeline_mode<synchronous>, transform_indices = @transform_2, window_bounds = array<i64: 1, 512>}, {pipeline_mode = #tpu.pipeline_mode<synchronous>, transform_indices = @transform_3, window_bounds = array<i64: 512, 512>}, {pipeline_mode = #tpu.pipeline_mode<synchronous>, transform_indices = @transform_4, window_bounds = array<i64: 1, 256>}, {pipeline_mode = #tpu.pipeline_mode<synchronous>, transform_indices = @transform_5, window_bounds = array<i64: 256, 40>}, {pipeline_mode = #tpu.pipeline_mode<synchronous>, transform_indices = @transform_6, window_bounds = array<i64: 1, 40>}, {pipeline_mode = #tpu.pipeline_mode<synchronous>, transform_indices = @transform_7, window_bounds = array<i64: 40, 8>}, {pipeline_mode = #tpu.pipeline_mode<synchronous>, transform_indices = @transform_8, window_bounds = array<i64: 1, 8>}, {transform_indices = @transform_9, window_bounds = array<i64: 8, 8>}]} {
    %c0 = arith.constant 0 : index
    %c0_0 = arith.constant 0 : index
    %0 = vector.load %arg1[%c0, %c0_0] : memref<8x32xf32, #tpu.memory_space<vmem>>, vector<8x32xf32>
    %1 = arith.truncf %0 : vector<8x32xf32> to vector<8x32xbf16>
    %c0_1 = arith.constant 0 : index
    %c0_2 = arith.constant 0 : index
    %2 = vector.load %arg2[%c0_1, %c0_2] : memref<32x1024xbf16, #tpu.memory_space<vmem>>, vector<32x1024xbf16>
    %cst = arith.constant dense<0.000000e+00> : vector<8x1024xf32>
    %3 = tpu.matmul %1, %2, %cst {dimension_numbers = #tpu.dot_dimension_numbers<[1], [0], [0], [1], [0, 0, 1, 1], [], []>} : vector<8x32xbf16>, vector<32x1024xbf16>, vector<8x1024xf32> -> vector<8x1024xf32>
    %c0_3 = arith.constant 0 : index
    %c0_4 = arith.constant 0 : index
    %4 = vector.load %arg3[%c0_3, %c0_4] : memref<1x512xf32, #tpu.memory_space<vmem>>, vector<1x512xf32>
    %5 = vector.extract_strided_slice %3 {offsets = [0, 0], sizes = [8, 512], strides = [1, 1]} : vector<8x1024xf32> to vector<8x512xf32>
    %6 = vector.broadcast %4 : vector<1x512xf32> to vector<8x512xf32>
    %7 = arith.addf %5, %6 : vector<8x512xf32>
    %cst_5 = arith.constant 0.000000e+00 : f32
    %8 = vector.broadcast %cst_5 : f32 to vector<8x512xf32>
    %9 = arith.maximumf %7, %8 : vector<8x512xf32>
    %10 = vector.extract_strided_slice %3 {offsets = [0, 512], sizes = [8, 512], strides = [1, 1]} : vector<8x1024xf32> to vector<8x512xf32>
    %11 = vector.broadcast %4 : vector<1x512xf32> to vector<8x512xf32>
    %12 = arith.addf %10, %11 : vector<8x512xf32>
    %cst_6 = arith.constant 0.000000e+00 : f32
    %13 = vector.broadcast %cst_6 : f32 to vector<8x512xf32>
    %14 = arith.maximumf %12, %13 : vector<8x512xf32>
    %15 = arith.maximumf %9, %14 : vector<8x512xf32>
    %16 = arith.truncf %15 : vector<8x512xf32> to vector<8x512xbf16>
    %c0_7 = arith.constant 0 : index
    %c0_8 = arith.constant 0 : index
    %17 = vector.load %arg4[%c0_7, %c0_8] : memref<512x512xbf16, #tpu.memory_space<vmem>>, vector<512x512xbf16>
    %cst_9 = arith.constant dense<0.000000e+00> : vector<8x512xf32>
    %18 = tpu.matmul %16, %17, %cst_9 {dimension_numbers = #tpu.dot_dimension_numbers<[1], [0], [0], [1], [0, 0, 1, 1], [], []>} : vector<8x512xbf16>, vector<512x512xbf16>, vector<8x512xf32> -> vector<8x512xf32>
    %c0_10 = arith.constant 0 : index
    %c0_11 = arith.constant 0 : index
    %19 = vector.load %arg5[%c0_10, %c0_11] : memref<1x256xf32, #tpu.memory_space<vmem>>, vector<1x256xf32>
    %20 = vector.extract_strided_slice %18 {offsets = [0, 0], sizes = [8, 256], strides = [1, 1]} : vector<8x512xf32> to vector<8x256xf32>
    %21 = vector.broadcast %19 : vector<1x256xf32> to vector<8x256xf32>
    %22 = arith.addf %20, %21 : vector<8x256xf32>
    %cst_12 = arith.constant 0.000000e+00 : f32
    %23 = vector.broadcast %cst_12 : f32 to vector<8x256xf32>
    %24 = arith.maximumf %22, %23 : vector<8x256xf32>
    %25 = vector.extract_strided_slice %18 {offsets = [0, 256], sizes = [8, 256], strides = [1, 1]} : vector<8x512xf32> to vector<8x256xf32>
    %26 = vector.broadcast %19 : vector<1x256xf32> to vector<8x256xf32>
    %27 = arith.addf %25, %26 : vector<8x256xf32>
    %cst_13 = arith.constant 0.000000e+00 : f32
    %28 = vector.broadcast %cst_13 : f32 to vector<8x256xf32>
    %29 = arith.maximumf %27, %28 : vector<8x256xf32>
    %30 = arith.maximumf %24, %29 : vector<8x256xf32>
    %31 = arith.truncf %30 : vector<8x256xf32> to vector<8x256xbf16>
    %c0_14 = arith.constant 0 : index
    %c0_15 = arith.constant 0 : index
    %32 = vector.load %arg6[%c0_14, %c0_15] : memref<256x40xbf16, #tpu.memory_space<vmem>>, vector<256x40xbf16>
    %cst_16 = arith.constant dense<0.000000e+00> : vector<8x40xf32>
    %33 = tpu.matmul %31, %32, %cst_16 {dimension_numbers = #tpu.dot_dimension_numbers<[1], [0], [0], [1], [0, 0, 1, 1], [], []>} : vector<8x256xbf16>, vector<256x40xbf16>, vector<8x40xf32> -> vector<8x40xf32>
    %c0_17 = arith.constant 0 : index
    %c0_18 = arith.constant 0 : index
    %34 = vector.load %arg7[%c0_17, %c0_18] : memref<1x40xf32, #tpu.memory_space<vmem>>, vector<1x40xf32>
    %35 = vector.broadcast %34 : vector<1x40xf32> to vector<8x40xf32>
    %36 = arith.addf %33, %35 : vector<8x40xf32>
    %cst_19 = arith.constant 0.000000e+00 : f32
    %37 = vector.broadcast %cst_19 : f32 to vector<8x40xf32>
    %38 = arith.maximumf %36, %37 : vector<8x40xf32>
    %39 = arith.truncf %38 : vector<8x40xf32> to vector<8x40xbf16>
    %c0_20 = arith.constant 0 : index
    %c0_21 = arith.constant 0 : index
    %40 = vector.load %arg8[%c0_20, %c0_21] : memref<40x8xbf16, #tpu.memory_space<vmem>>, vector<40x8xbf16>
    %cst_22 = arith.constant dense<0.000000e+00> : vector<8x8xf32>
    %41 = tpu.matmul %39, %40, %cst_22 {dimension_numbers = #tpu.dot_dimension_numbers<[1], [0], [0], [1], [0, 0, 1, 1], [], []>} : vector<8x40xbf16>, vector<40x8xbf16>, vector<8x8xf32> -> vector<8x8xf32>
    %c0_23 = arith.constant 0 : index
    %c0_24 = arith.constant 0 : index
    %42 = vector.load %arg9[%c0_23, %c0_24] : memref<1x8xf32, #tpu.memory_space<vmem>>, vector<1x8xf32>
    %43 = vector.broadcast %42 : vector<1x8xf32> to vector<8x8xf32>
    %44 = arith.addf %41, %43 : vector<8x8xf32>
    %c0_25 = arith.constant 0 : index
    %c0_26 = arith.constant 0 : index
    %45 = vector.load %arg10[%c0_25, %c0_26] : memref<8x8xf32, #tpu.memory_space<vmem>>, vector<8x8xf32>
    tpu.vector_store %arg10[%c0_25, %c0_26], %44 {strides = array<i32>} : memref<8x8xf32, #tpu.memory_space<vmem>>, vector<8x8xf32>,
    return
  }
  func.func @transform_0(%arg0: i32) -> (i32, i32) {
    %c0_i32 = arith.constant 0 : i32
    %c0_i32_0 = arith.constant 0 : i32
    return %arg0, %c0_i32 : i32, i32
  }
  func.func @transform_1(%arg0: i32) -> (i32, i32) {
    %c0_i32 = arith.constant 0 : i32
    %c0_i32_0 = arith.constant 0 : i32
    %c0_i32_1 = arith.constant 0 : i32
    return %c0_i32, %c0_i32_0 : i32, i32
  }
  func.func @transform_2(%arg0: i32) -> (i32, i32) {
    %c0_i32 = arith.constant 0 : i32
    %c0_i32_0 = arith.constant 0 : i32
    %c0_i32_1 = arith.constant 0 : i32
    return %c0_i32, %c0_i32_0 : i32, i32
  }
  func.func @transform_3(%arg0: i32) -> (i32, i32) {
    %c0_i32 = arith.constant 0 : i32
    %c0_i32_0 = arith.constant 0 : i32
    %c0_i32_1 = arith.constant 0 : i32
    return %c0_i32, %c0_i32_0 : i32, i32
  }
  func.func @transform_4(%arg0: i32) -> (i32, i32) {
    %c0_i32 = arith.constant 0 : i32
    %c0_i32_0 = arith.constant 0 : i32
    %c0_i32_1 = arith.constant 0 : i32
    return %c0_i32, %c0_i32_0 : i32, i32
  }
  func.func @transform_5(%arg0: i32) -> (i32, i32) {
    %c0_i32 = arith.constant 0 : i32
    %c0_i32_0 = arith.constant 0 : i32
    %c0_i32_1 = arith.constant 0 : i32
    return %c0_i32, %c0_i32_0 : i32, i32
  }
  func.func @transform_6(%arg0: i32) -> (i32, i32) {
    %c0_i32 = arith.constant 0 : i32
    %c0_i32_0 = arith.constant 0 : i32
    %c0_i32_1 = arith.constant 0 : i32
    return %c0_i32, %c0_i32_0 : i32, i32
  }
  func.func @transform_7(%arg0: i32) -> (i32, i32) {
    %c0_i32 = arith.constant 0 : i32
    %c0_i32_0 = arith.constant 0 : i32
    %c0_i32_1 = arith.constant 0 : i32
    return %c0_i32, %c0_i32_0 : i32, i32
  }
  func.func @transform_8(%arg0: i32) -> (i32, i32) {
    %c0_i32 = arith.constant 0 : i32
    %c0_i32_0 = arith.constant 0 : i32
    %c0_i32_1 = arith.constant 0 : i32
    return %c0_i32, %c0_i32_0 : i32, i32
  }
  func.func @transform_9(%arg0: i32) -> (i32, i32) {
    %c0_i32 = arith.constant 0 : i32
    %c0_i32_0 = arith.constant 0 : i32
    return %arg0, %c0_i32 : i32, i32
  }
}

</mosaic_0001>

<bundles_post_ra>
// kernel: deepant_forward.1
= control target key start
LH: loop header
LB: loop body
LE: loop exit
PB: predicated region body
PF: predicated region fallthrough
CT: control target
= control target key end

     0   :  { %14 = vsyncpa [#allocation3], 0  ;;  %s2345_s12 = smov [#allocation2]   ;;  %s2346_s14 = smov 256   ;;  %s2623_s0 = inlined_call_operand.vmem [shape: f32[8,32], index: 0, kind: input, shape index: {}]   ;;  %s2624_s1 = inlined_call_operand.vmem [shape: bf16[32,1024], index: 1, kind: input, shape index: {}]   ;;  %s2625_s2 = inlined_call_operand.vmem [shape: f32[1,512], index: 2, kind: input, shape index: {}]   ;;  %s2626_s3 = inlined_call_operand.hbm [shape: bf16[512,512], index: 3, kind: input, shape index: {}]   ;;  %s2627_s4 = inlined_call_operand.vmem [shape: f32[1,256], index: 4, kind: input, shape index: {}]   ;;  %s2628_s5 = inlined_call_operand.vmem [shape: bf16[256,40], index: 5, kind: input, shape index: {}]   ;;  %s2629_s6 = inlined_call_operand.vmem [shape: f32[1,40], index: 6, kind: input, shape index: {}]   ;;  %s2630_s7 = inlined_call_operand.vmem [shape: bf16[40,8], index: 7, kind: input, shape index: {}]   ;;  %s2631_s8 = inlined_call_operand.vmem [shape: f32[1,8], index: 8, kind: input, shape index: {}]   ;;  %s2632_s9 = inlined_call_operand.vmem [shape: f32[8,8], index: 9, kind: output, shape index: {}]  }
   0x1   :  { %s25_s11 = sshll.u32 %s2626_s3, 4  ;;  %s27_s13 = sshll.u32 %s2345_s12, 4  ;;  %s26_s11 = int_to_ptr.hbm [resolvable:$true] %s25_s11  ;;  %s28_s13 = int_to_ptr.vmem [resolvable:$true] %s27_s13 }
   0x2   :  { %s2347_s15 = smov 16  }
   0x3   :  { %33 = dma.hbm_to_vmem [thread:$0]  %s26_s11, 16384, %s28_s13, [#allocation3], %s2346_s14, %s2346_s14, %s2347_s15  }
   0x4   :  { %2343 = dma.done.wait [#allocation3], 16384  }
   0x5   :  { %2344 = vsyncadd [#allocation3], 4294950912  ;;  %v1529_v0 = vld [vmem:[%s2624_s1 + $0x40] sm:$0xf]  ;;  %v2160_v2 = vld [vmem:[%s2624_s1 + $0x44] sm:$0xf] }
   0x6   :  { %v2164_v1 = vld [vmem:[%s2624_s1 + $0x5c] sm:$0xf0]  ;;  %v1531_v4 = vld [vmem:[%s2624_s1 + $0x60] sm:$0xf0]  ;;  %v1537_v5 = vld [vmem:[%s2624_s1 + $0x48] sm:$0xf] }
   0x7   :  { %v1530_v3 = vor.u32 %v2164_v1, %v1529_v0  ;;  %v2165_v6 = vld [vmem:[%s2624_s1 + $0x64] sm:$0xf0]  ;;  %v1534_v7 = vor.u32 %v2160_v2, %v1531_v4  ;;  %v1497_v9 = vld [vmem:[%s2624_s1] sm:$0xf]  ;;  %v2152_v11 = vld [vmem:[%s2624_s1 + $0x4] sm:$0xf] }
   0x8   :  { %v1538_v8 = vor.u32 %v2165_v6, %v1537_v5  ;;  %v2156_v10 = vld [vmem:[%s2624_s1 + $0x1c] sm:$0xf0]  ;;  %v1499_v13 = vld [vmem:[%s2624_s1 + $0x20] sm:$0xf0]  ;;  %v1505_v14 = vld [vmem:[%s2624_s1 + $0x8] sm:$0xf] }
   0x9   :  { %157 = vmatpush.bf16.msra.mxu3 %v1530_v3  ;;  %v1498_v12 = vor.u32 %v2156_v10, %v1497_v9  ;;  %v2157_v15 = vld [vmem:[%s2624_s1 + $0x24] sm:$0xf0]  ;;  %170 = vmatpush.bf16.msra.mxu1 %v1534_v7  ;;  %v1502_v16 = vor.u32 %v2152_v11, %v1499_v13  ;;  %v1545_v18 = vld [vmem:[%s2624_s1 + $0x50] sm:$0xf]  ;;  %v49_v20 = vld [vmem:[%s2623_s0] sm:$0xff]  ;;  %vm147_vm0 = vcmask 261120  }
   0xa   :  { %183 = vmatpush.bf16.msra.mxu2 %v1538_v8  ;;  %v1506_v17 = vor.u32 %v2157_v15, %v1505_v14  ;;  %v2166_v19 = vld [vmem:[%s2624_s1 + $0x6c] sm:$0xf0]  ;;  %v2161_v24 = vld [vmem:[%s2624_s1 + $0x4c] sm:$0xf]  ;;  %v2455_v25 = vpack.c.bf16 %v49_v20, %v49_v20  ;;  %v2162_v27 = vld [vmem:[%s2624_s1 + $0x54] sm:$0xf] }
   0xb   :  { %v1546_v21 = vor.u32 %v2166_v19, %v1545_v18  ;;  %v1513_v22 = vld [vmem:[%s2624_s1 + $0x10] sm:$0xf]  ;;  %v1539_v26 = vld [vmem:[%s2624_s1 + $0x68] sm:$0xf0]  ;;  %v1547_v28 = vld [vmem:[%s2624_s1 + $0x70] sm:$0xf0] }
   0xc   :  { %v2158_v23 = vld [vmem:[%s2624_s1 + $0x2c] sm:$0xf0]  ;;  %v1542_v29 = vor.u32 %v2161_v24, %v1539_v26  ;;  %v1550_v30 = vor.u32 %v2162_v27, %v1547_v28  ;;  %v1553_v31 = vld [vmem:[%s2624_s1 + $0x58] sm:$0xf]  ;;  %v2153_v33 = vld [vmem:[%s2624_s1 + $0xc] sm:$0xf] }
   0xd   :  { %158 = vmatpush.bf16.msra.mxu3 %v1498_v12  ;;  %209 = vmatpush.bf16.msra.mxu0 %v1546_v21  ;;  %v2167_v32 = vld [vmem:[%s2624_s1 + $0x74] sm:$0xf0]  ;;  %v1514_v34 = vor.u32 %v2158_v23, %v1513_v22  ;;  %v1507_v36 = vld [vmem:[%s2624_s1 + $0x28] sm:$0xf0]  ;;  %v2154_v37 = vld [vmem:[%s2624_s1 + $0x14] sm:$0xf] }
   0xe   :  { %171 = vmatpush.bf16.msra.mxu1 %v1502_v16  ;;  %184 = vmatpush.bf16.msra.mxu2 %v1506_v17  ;;  %v1554_v35 = vor.u32 %v2167_v32, %v1553_v31  ;;  %v1515_v38 = vld [vmem:[%s2624_s1 + $0x30] sm:$0xf0]  ;;  %v1510_v39 = vor.u32 %v2153_v33, %v1507_v36  ;;  %v1521_v41 = vld [vmem:[%s2624_s1 + $0x18] sm:$0xf]  ;;  %v2163_v43 = vld [vmem:[%s2624_s1 + $0x5c] sm:$0xf] }
   0xf   :  { %v1518_v40 = vor.u32 %v2154_v37, %v1515_v38  ;;  %v2159_v42 = vld [vmem:[%s2624_s1 + $0x34] sm:$0xf0]  ;;  %v1555_v45 = vld [vmem:[%s2624_s1 + $0x78] sm:$0xf0]  ;;  %v1681_v49 = vld [vmem:[#allocation2 + $0xe0] sm:$0xf] }
  0x10   :  { %1559 = vmatmul.msk.bf16.vlgmr.msra.gmra.mxu3 %vm147_vm0, %v2455_v25  ;;  %v1522_v44 = vor.u32 %v2159_v42, %v1521_v41  ;;  %v2155_v46 = vld [vmem:[%s2624_s1 + $0x1c] sm:$0xf]  ;;  %v1558_v47 = vor.u32 %v2163_v43, %v1555_v45  ;;  %v2198_v50 = vld [vmem:[#allocation2 + $0xec] sm:$0xf0]  ;;  %v1665_v52 = vld [vmem:[#allocation2 + $0xc0] sm:$0xf] }
  0x11   :  { %196 = vmatpush.bf16.msrb.mxu3 %v1542_v29  ;;  %1560 = vmatmul.msk.bf16.vlgmr.msra.gmra.mxu1 %vm147_vm0, %v2455_v25  ;;  %v1523_v48 = vld [vmem:[%s2624_s1 + $0x38] sm:$0xf0]  ;;  %v1682_v51 = vor.u32 %v2198_v50, %v1681_v49  ;;  %v2194_v53 = vld [vmem:[#allocation2 + $0xcc] sm:$0xf0]  ;;  %v1809_v54 = vld [vmem:[#allocation2 + $0x1e0] sm:$0xf] }
  0x12   :  { %222 = vmatpush.bf16.msrb.mxu1 %v1550_v30  ;;  %235 = vmatpush.bf16.msrb.mxu2 %v1554_v35  ;;  %v2230_v55 = vld [vmem:[#allocation2 + $0x1ec] sm:$0xf0]  ;;  %v1526_v56 = vor.u32 %v2155_v46, %v1523_v48  ;;  %v1793_v58 = vld [vmem:[#allocation2 + $0x1c0] sm:$0xf]  ;;  %v1666_v61 = vor.u32 %v2194_v53, %v1665_v52  ;;  %vm1471_vm1 = vcmask 1043456   ;;  %vm1467_vm2 = vcmask 326656  }
  0x13   :  { %1561 = vmatmul.msk.bf16.vlgmr.msra.gmra.mxu2 %vm147_vm0, %v2455_v25  ;;  %210 = vmatpush.bf16.msra.mxu0 %v1514_v34  ;;  %v1810_v57 = vor.u32 %v2230_v55, %v1809_v54  ;;  %v2226_v59 = vld [vmem:[#allocation2 + $0x1cc] sm:$0xf0]  ;;  %v1937_v60 = vld [vmem:[#allocation2 + $0x2e0] sm:$0xf]  ;;  %vm1488_vm3 = vcmask 64512  }
  0x14   :  { %v1649_v62 = vld [vmem:[#allocation2 + $0xa0] sm:$0xf]  ;;  %v2190_v63 = vld [vmem:[#allocation2 + $0xac] sm:$0xf0]  ;;  %v1794_v0 = vor.u32 %v2226_v59, %v1793_v58 }
  0x15   :  { %197 = vmatpush.bf16.msrb.mxu3 %v1510_v39  ;;  %v2262_v1 = vld [vmem:[#allocation2 + $0x2ec] sm:$0xf0]  ;;  %v1777_v3 = vld [vmem:[#allocation2 + $0x1a0] sm:$0xf]  ;;  %v1650_v8 = vor.u32 %v2190_v63, %v1649_v62  ;;  %v2228_v62 = vld [vmem:[#allocation2 + $0x1e4] sm:$0xf] }
  0x16   :  { %223 = vmatpush.bf16.msrb.mxu1 %v1518_v40  ;;  %236 = vmatpush.bf16.msrb.mxu2 %v1522_v44  ;;  %v1938_v2 = vor.u32 %v2262_v1, %v1937_v60  ;;  %v2222_v4 = vld [vmem:[#allocation2 + $0x1ac] sm:$0xf0]  ;;  %v1921_v5 = vld [vmem:[#allocation2 + $0x2c0] sm:$0xf]  ;;  %v1811_v63 = vld [vmem:[#allocation2 + $0x1f0] sm:$0xf0] }
  0x17   :  { %1563 = vmatmul.msk.bf16.vlgmr.msra.gmra.mxu0 %vm147_vm0, %v2455_v25  ;;  %v2258_v6 = vld [vmem:[#allocation2 + $0x2cc] sm:$0xf0]  ;;  %v1633_v9 = vld [vmem:[#allocation2 + $0x80] sm:$0xf]  ;;  %v1778_v10 = vor.u32 %v2222_v4, %v1777_v3 }
  0x18   :  { %1057 = vmatpush.bf16.msrb.mxu0 %v1682_v51  ;;  %v1922_v7 = vor.u32 %v2258_v6, %v1921_v5  ;;  %v2186_v11 = vld [vmem:[#allocation2 + $0x8c] sm:$0xf0]  ;;  %v1761_v12 = vld [vmem:[#allocation2 + $0x180] sm:$0xf]  ;;  %v1814_v5 = vor.u32 %v2228_v62, %v1811_v63  ;;  %v2192_v6 = vld [vmem:[#allocation2 + $0xc4] sm:$0xf] }
  0x19   :  { %248 = vmatpush.bf16.msra.mxu3 %v1558_v47  ;;  %v2218_v13 = vld [vmem:[#allocation2 + $0x18c] sm:$0xf0]  ;;  %v1905_v14 = vld [vmem:[#allocation2 + $0x2a0] sm:$0xf]  ;;  %v1634_v16 = vor.u32 %v2186_v11, %v1633_v9  ;;  %v1651_v11 = vld [vmem:[#allocation2 + $0xb0] sm:$0xf0] }
  0x1a   :  { %1070 = vmatpush.bf16.msra.mxu1 %v1810_v57  ;;  %1083 = vmatpush.bf16.msra.mxu2 %v1938_v2  ;;  %v2254_v15 = vld [vmem:[#allocation2 + $0x2ac] sm:$0xf0]  ;;  %v1617_v17 = vld [vmem:[#allocation2 + $0x60] sm:$0xf]  ;;  %v1762_v18 = vor.u32 %v2218_v13, %v1761_v12  ;;  %v2196_v57 = vld [vmem:[#allocation2 + $0xe4] sm:$0xf] }
  0x1b   :  { %v2065_v19 = vld [vmem:[#allocation2 + $0x3e0] sm:$0xf]  ;;  %v2294_v20 = vld [vmem:[#allocation2 + $0x3ec] sm:$0xf0]  ;;  %v1906_v22 = vor.u32 %v2254_v15, %v1905_v14  ;;  %v2184_v13 = vld [vmem:[#allocation2 + $0x84] sm:$0xf] }
  0x1c   :  { %1058 = vmatpush.bf16.msrb.mxu0 %v1666_v61  ;;  %v2182_v21 = vld [vmem:[#allocation2 + $0x6c] sm:$0xf0]  ;;  %v1745_v23 = vld [vmem:[#allocation2 + $0x160] sm:$0xf]  ;;  %v2066_v26 = vor.u32 %v2294_v20, %v2065_v19  ;;  %v1683_v61 = vld [vmem:[#allocation2 + $0xf0] sm:$0xf0] }
  0x1d   :  { %249 = vmatpush.bf16.msra.mxu3 %v1526_v56  ;;  %v2214_v24 = vld [vmem:[#allocation2 + $0x16c] sm:$0xf0]  ;;  %v1889_v27 = vld [vmem:[#allocation2 + $0x280] sm:$0xf]  ;;  %v1618_v31 = vor.u32 %v2182_v21, %v1617_v17  ;;  %v1686_v4 = vor.u32 %v2196_v57, %v1683_v61  ;;  %v1635_v14 = vld [vmem:[#allocation2 + $0x90] sm:$0xf0] }
  0x1e   :  { %1071 = vmatpush.bf16.msra.mxu1 %v1794_v0  ;;  %1084 = vmatpush.bf16.msra.mxu2 %v1922_v7  ;;  %v2250_v28 = vld [vmem:[#allocation2 + $0x28c] sm:$0xf0]  ;;  %v2049_v29 = vld [vmem:[#allocation2 + $0x3c0] sm:$0xf]  ;;  %v1746_v34 = vor.u32 %v2214_v24, %v1745_v23  ;;  %v1667_v7 = vld [vmem:[#allocation2 + $0xd0] sm:$0xf0]  ;;  %v1638_v15 = vor.u32 %v2184_v13, %v1635_v14 }
  0x1f   :  { %v2290_v30 = vld [vmem:[#allocation2 + $0x3cc] sm:$0xf0]  ;;  %v1601_v32 = vld [vmem:[#allocation2 + $0x40] sm:$0xf]  ;;  %v1890_v35 = vor.u32 %v2250_v28, %v1889_v27  ;;  %v1670_v9 = vor.u32 %v2192_v6, %v1667_v7  ;;  %v2180_v23 = vld [vmem:[#allocation2 + $0x64] sm:$0xf] }
  0x20   :  { %1059 = vmatpush.bf16.msrb.mxu0 %v1650_v8  ;;  %1562 = vmatmul.msk.bf16.vlgmr.msrb.gmra.mxu3 %vm147_vm0, %v2455_v25  ;;  %v2178_v33 = vld [vmem:[#allocation2 + $0x4c] sm:$0xf0]  ;;  %v1729_v36 = vld [vmem:[#allocation2 + $0x140] sm:$0xf]  ;;  %v2050_v39 = vor.u32 %v2290_v30, %v2049_v29  ;;  %v1619_v24 = vld [vmem:[#allocation2 + $0x70] sm:$0xf0] }
  0x21   :  { %1564 = vmatmul.msk.bf16.vlgmr.msrb.gmra.mxu1 %vm147_vm0, %v2455_v25  ;;  %v2210_v37 = vld [vmem:[#allocation2 + $0x14c] sm:$0xf0]  ;;  %v1873_v38 = vld [vmem:[#allocation2 + $0x260] sm:$0xf]  ;;  %1096 = vmatpush.bf16.msrb.mxu3 %v2066_v26  ;;  %v1602_v43 = vor.u32 %v2178_v33, %v1601_v32  ;;  %v1622_v27 = vor.u32 %v2180_v23, %v1619_v24  ;;  %v2260_v28 = vld [vmem:[#allocation2 + $0x2e4] sm:$0xf] }
  0x22   :  { %1072 = vmatpush.bf16.msra.mxu1 %v1778_v10  ;;  %1085 = vmatpush.bf16.msra.mxu2 %v1906_v22  ;;  %v2246_v40 = vld [vmem:[#allocation2 + $0x26c] sm:$0xf0]  ;;  %v2033_v41 = vld [vmem:[#allocation2 + $0x3a0] sm:$0xf]  ;;  %v1730_v45 = vor.u32 %v2210_v37, %v1729_v36  ;;  %v2188_v10 = vld [vmem:[#allocation2 + $0xa4] sm:$0xf] }
  0x23   :  { %1565 = vmatmul.msk.bf16.vlgmr.msrb.gmra.mxu2 %vm147_vm0, %v2455_v25  ;;  %v2286_v42 = vld [vmem:[#allocation2 + $0x3ac] sm:$0xf0]  ;;  %v1585_v44 = vld [vmem:[#allocation2 + $0x20] sm:$0xf]  ;;  %v1874_v47 = vor.u32 %v2246_v40, %v1873_v38  ;;  %v1654_v12 = vor.u32 %v2188_v10, %v1651_v11  ;;  %v1939_v29 = vld [vmem:[#allocation2 + $0x2f0] sm:$0xf0] }
  0x24   :  { %1060 = vmatpush.bf16.msrb.mxu0 %v1634_v16  ;;  %v2174_v46 = vld [vmem:[#allocation2 + $0x2c] sm:$0xf0]  ;;  %v1713_v48 = vld [vmem:[#allocation2 + $0x120] sm:$0xf]  ;;  %v2034_v50 = vor.u32 %v2286_v42, %v2033_v41  ;;  %v2224_v16 = vld [vmem:[#allocation2 + $0x1c4] sm:$0xf]  ;;  %v1942_v30 = vor.u32 %v2260_v28, %v1939_v29 }
  0x25   :  { %v2206_v49 = vld [vmem:[#allocation2 + $0x12c] sm:$0xf0]  ;;  %1097 = vmatpush.bf16.msrb.mxu3 %v2050_v39  ;;  %v1857_v51 = vld [vmem:[#allocation2 + $0x240] sm:$0xf]  ;;  %v1586_v53 = vor.u32 %v2174_v46, %v1585_v44  ;;  %v1779_v32 = vld [vmem:[#allocation2 + $0x1b0] sm:$0xf0] }
  0x26   :  { %1073 = vmatpush.bf16.msra.mxu1 %v1762_v18  ;;  %1086 = vmatpush.bf16.msra.mxu2 %v1890_v35  ;;  %v2242_v52 = vld [vmem:[#allocation2 + $0x24c] sm:$0xf0]  ;;  %v1569_v54 = vld [vmem:[#allocation2] sm:$0xf]  ;;  %v1714_v56 = vor.u32 %v2206_v49, %v1713_v48  ;;  %v2176_v37 = vld [vmem:[#allocation2 + $0x44] sm:$0xf] }
  0x27   :  { %v2170_v55 = vld [vmem:[#allocation2 + $0xc] sm:$0xf0]  ;;  %v1858_v58 = vor.u32 %v2242_v52, %v1857_v51  ;;  %v1697_v59 = vld [vmem:[#allocation2 + $0x100] sm:$0xf]  ;;  %v1603_v38 = vld [vmem:[#allocation2 + $0x50] sm:$0xf0] }
  0x28   :  { %1061 = vmatpush.bf16.msrb.mxu0 %v1618_v31  ;;  %v2202_v60 = vld [vmem:[#allocation2 + $0x10c] sm:$0xf0]  ;;  %v1841_v0 = vld [vmem:[#allocation2 + $0x220] sm:$0xf]  ;;  %v1570_v2 = vor.u32 %v2170_v55, %v1569_v54  ;;  %v2220_v31 = vld [vmem:[#allocation2 + $0x1a4] sm:$0xf]  ;;  %v1606_v40 = vor.u32 %v2176_v37, %v1603_v38 }
  0x29   :  { %1098 = vmatpush.bf16.msrb.mxu3 %v2034_v50  ;;  %v2238_v1 = vld [vmem:[#allocation2 + $0x22c] sm:$0xf0]  ;;  %v1698_v3 = vor.u32 %v2202_v60, %v1697_v59  ;;  %v1825_v18 = vld [vmem:[#allocation2 + $0x200] sm:$0xf]  ;;  %v1782_v33 = vor.u32 %v2220_v31, %v1779_v32  ;;  %v2256_v39 = vld [vmem:[#allocation2 + $0x2c4] sm:$0xf] }
  0x2a   :  { %1074 = vmatpush.bf16.msra.mxu1 %v1746_v34  ;;  %1087 = vmatpush.bf16.msra.mxu2 %v1874_v47  ;;  %v1842_v8 = vor.u32 %v2238_v1, %v1841_v0  ;;  %v2234_v19 = vld [vmem:[#allocation2 + $0x20c] sm:$0xf0]  ;;  %v2017_v20 = vld [vmem:[#allocation2 + $0x380] sm:$0xf]  ;;  %v1923_v41 = vld [vmem:[#allocation2 + $0x2d0] sm:$0xf0] }
  0x2b   :  { %v1826_v21 = vor.u32 %v2234_v19, %v1825_v18  ;;  %v2282_v22 = vld [vmem:[#allocation2 + $0x38c] sm:$0xf0]  ;;  %v2001_v34 = vld [vmem:[#allocation2 + $0x360] sm:$0xf]  ;;  %v1926_v42 = vor.u32 %v2256_v39, %v1923_v41  ;;  %v1763_v44 = vld [vmem:[#allocation2 + $0x190] sm:$0xf0] }
  0x2c   :  { %1062 = vmatpush.bf16.msrb.mxu0 %v1602_v43  ;;  %v2018_v26 = vor.u32 %v2282_v22, %v2017_v20  ;;  %v2278_v35 = vld [vmem:[#allocation2 + $0x36c] sm:$0xf0]  ;;  %v2216_v43 = vld [vmem:[#allocation2 + $0x184] sm:$0xf]  ;;  %v1985_v46 = vld [vmem:[#allocation2 + $0x340] sm:$0xf] }
  0x2d   :  { %v2002_v36 = vor.u32 %v2278_v35, %v2001_v34  ;;  %v2274_v47 = vld [vmem:[#allocation2 + $0x34c] sm:$0xf0]  ;;  %v2172_v49 = vld [vmem:[#allocation2 + $0x24] sm:$0xf]  ;;  %v1587_v50 = vld [vmem:[#allocation2 + $0x30] sm:$0xf0] }
  0x2e   :  { %1075 = vmatpush.bf16.msra.mxu1 %v1730_v45  ;;  %1088 = vmatpush.bf16.msra.mxu2 %v1858_v58  ;;  %v1766_v45 = vor.u32 %v2216_v43, %v1763_v44  ;;  %v1986_v48 = vor.u32 %v2274_v47, %v1985_v46  ;;  %v2252_v51 = vld [vmem:[#allocation2 + $0x2a4] sm:$0xf]  ;;  %v1590_v52 = vor.u32 %v2172_v49, %v1587_v50  ;;  %v1969_v58 = vld [vmem:[#allocation2 + $0x320] sm:$0xf]  ;;  %v2270_v59 = vld [vmem:[#allocation2 + $0x32c] sm:$0xf0] }
  0x2f   :  { %1099 = vmatpush.bf16.msrb.mxu3 %v2018_v26  ;;  %v2212_v55 = vld [vmem:[#allocation2 + $0x164] sm:$0xf]  ;;  %v1970_v60 = vor.u32 %v2270_v59, %v1969_v58  ;;  %v1571_v62 = vld [vmem:[#allocation2 + $0x10] sm:$0xf0]  ;;  %v1953_v6 = vld [vmem:[#allocation2 + $0x300] sm:$0xf] }
  0x30   :  { %1063 = vmatpush.bf16.msrb.mxu0 %v1586_v53  ;;  %1566 = vmatmul.msk.bf16.vlgmr.msra.gmra.mxu3 %vm147_vm0, %v2455_v25  ;;  %v1795_v25 = vld [vmem:[#allocation2 + $0x1d0] sm:$0xf0]  ;;  %v2168_v61 = vld [vmem:[#allocation2 + $0x4] sm:$0xf]  ;;  %v2266_v7 = vld [vmem:[#allocation2 + $0x30c] sm:$0xf0] }
  0x31   :  { %v1798_v17 = vor.u32 %v2224_v16, %v1795_v25  ;;  %v1907_v53 = vld [vmem:[#allocation2 + $0x2b0] sm:$0xf0]  ;;  %v2248_v63 = vld [vmem:[#allocation2 + $0x284] sm:$0xf]  ;;  %v1574_v0 = vor.u32 %v2168_v61, %v1571_v62  ;;  %v2521_v38 = vld [vmem:[%s2625_s2] sm:$0xf] }
  0x32   :  { %1076 = vmatpush.bf16.msra.mxu1 %v1714_v56  ;;  %1089 = vmatpush.bf16.msra.mxu2 %v1842_v8  ;;  %v1910_v54 = vor.u32 %v2252_v51, %v1907_v53  ;;  %v1747_v56 = vld [vmem:[#allocation2 + $0x170] sm:$0xf0]  ;;  %v1954_v8 = vor.u32 %v2266_v7, %v1953_v6  ;;  %v2292_v11 = vld [vmem:[#allocation2 + $0x3e4] sm:$0xf]  ;;  %v257_v43 = vperm.slane %v2521_v38, 0 }
  0x33   :  { %1100 = vmatpush.bf16.msrb.mxu3 %v2002_v36  ;;  %v1750_v57 = vor.u32 %v2212_v55, %v1747_v56  ;;  %v1891_v1 = vld [vmem:[#allocation2 + $0x290] sm:$0xf0]  ;;  %v2288_v19 = vld [vmem:[#allocation2 + $0x3c4] sm:$0xf]  ;;  %v2199_v55 = vld [vmem:[#allocation2 + $0xf4] sm:$0xf0] }
  0x34   :  { %1064 = vmatpush.bf16.msrb.mxu0 %v1570_v2  ;;  %v1894_v2 = vor.u32 %v2248_v63, %v1891_v1  ;;  %v1875_v10 = vld [vmem:[#allocation2 + $0x270] sm:$0xf0]  ;;  %v2200_v23 = vld [vmem:[#allocation2 + $0x104] sm:$0xf] }
  0x35   :  { %v2067_v13 = vld [vmem:[#allocation2 + $0x3f0] sm:$0xf0]  ;;  %v2284_v29 = vld [vmem:[#allocation2 + $0x3a4] sm:$0xf] }
  0x36   :  { %1077 = vmatpush.bf16.msra.mxu1 %v1698_v3  ;;  %1090 = vmatpush.bf16.msra.mxu2 %v1826_v21  ;;  %v2208_v3 = vld [vmem:[#allocation2 + $0x144] sm:$0xf]  ;;  %v2070_v14 = vor.u32 %v2292_v11, %v2067_v13  ;;  %v1715_v16 = vld [vmem:[#allocation2 + $0x130] sm:$0xf0]  ;;  %v2191_v13 = vld [vmem:[#allocation2 + $0xb4] sm:$0xf0] }
  0x37   :  { %1101 = vmatpush.bf16.msrb.mxu3 %v1986_v48  ;;  %v1859_v18 = vld [vmem:[#allocation2 + $0x250] sm:$0xf0]  ;;  %v2280_v35 = vld [vmem:[#allocation2 + $0x384] sm:$0xf] }
  0x38   :  { %1109 = vmatpush.bf16.msra.mxu0 %v1686_v4  ;;  %v1731_v4 = vld [vmem:[#allocation2 + $0x150] sm:$0xf0]  ;;  %v2276_v41 = vld [vmem:[#allocation2 + $0x364] sm:$0xf] }
  0x39   :  { %v2051_v21 = vld [vmem:[#allocation2 + $0x3d0] sm:$0xf0]  ;;  %v2272_v46 = vld [vmem:[#allocation2 + $0x344] sm:$0xf] }
  0x3a   :  { %1122 = vmatpush.bf16.msrb.mxu1 %v1814_v5  ;;  %1135 = vmatpush.bf16.msrb.mxu2 %v1942_v30  ;;  %v1734_v5 = vor.u32 %v2208_v3, %v1731_v4  ;;  %v2054_v22 = vor.u32 %v2288_v19, %v2051_v21  ;;  %v1699_v24 = vld [vmem:[#allocation2 + $0x110] sm:$0xf0]  ;;  %v2268_v58 = vld [vmem:[#allocation2 + $0x324] sm:$0xf]  ;;  %v2231_v19 = vld [vmem:[#allocation2 + $0x1f4] sm:$0xf0] }
  0x3b   :  { %1102 = vmatpush.bf16.msrb.mxu3 %v1970_v60  ;;  %v1702_v26 = vor.u32 %v2200_v23, %v1699_v24  ;;  %v1843_v28 = vld [vmem:[#allocation2 + $0x230] sm:$0xf0]  ;;  %v258_v60 = vperm.slane %v2521_v38, 1  ;;  %v2264_v4 = vld [vmem:[#allocation2 + $0x304] sm:$0xf] }
  0x3c   :  { %1110 = vmatpush.bf16.msra.mxu0 %v1670_v9  ;;  %v2244_v9 = vld [vmem:[#allocation2 + $0x264] sm:$0xf]  ;;  %v2035_v31 = vld [vmem:[#allocation2 + $0x3b0] sm:$0xf0]  ;;  %v2187_v21 = vld [vmem:[#allocation2 + $0x94] sm:$0xf0] }
  0x3d   :  { %v2038_v32 = vor.u32 %v2284_v29, %v2035_v31  ;;  %v1827_v34 = vld [vmem:[#allocation2 + $0x210] sm:$0xf0]  ;;  %v1801_v31 = vld [vmem:[#allocation2 + $0x1c8] sm:$0xf] }
  0x3e   :  { %1123 = vmatpush.bf16.msrb.mxu1 %v1798_v17  ;;  %1136 = vmatpush.bf16.msrb.mxu2 %v1926_v42  ;;  %v2240_v17 = vld [vmem:[#allocation2 + $0x244] sm:$0xf]  ;;  %v2019_v37 = vld [vmem:[#allocation2 + $0x390] sm:$0xf0] }
  0x3f   :  { %1103 = vmatpush.bf16.msrb.mxu3 %v1954_v8  ;;  %v1862_v20 = vor.u32 %v2240_v17, %v1859_v18  ;;  %v2022_v39 = vor.u32 %v2280_v35, %v2019_v37  ;;  %v2003_v42 = vld [vmem:[#allocation2 + $0x370] sm:$0xf0]  ;;  %v1817_v18 = vld [vmem:[#allocation2 + $0x1e8] sm:$0xf] }
  0x40   :  { %1111 = vmatpush.bf16.msra.mxu0 %v1654_v12  ;;  %v1878_v12 = vor.u32 %v2244_v9, %v1875_v10  ;;  %v2006_v44 = vor.u32 %v2276_v41, %v2003_v42  ;;  %v1987_v47 = vld [vmem:[#allocation2 + $0x350] sm:$0xf0] }
  0x41   :  { %v1990_v50 = vor.u32 %v2272_v46, %v1987_v47  ;;  %v1971_v59 = vld [vmem:[#allocation2 + $0x330] sm:$0xf0]  ;;  %v1609_v47 = vld [vmem:[#allocation2 + $0x48] sm:$0xf] }
  0x42   :  { %1124 = vmatpush.bf16.msrb.mxu1 %v1782_v33  ;;  %1137 = vmatpush.bf16.msrb.mxu2 %v1910_v54  ;;  %v2232_v33 = vld [vmem:[#allocation2 + $0x204] sm:$0xf]  ;;  %v1689_v54 = vld [vmem:[#allocation2 + $0xe8] sm:$0xf]  ;;  %v1974_v61 = vor.u32 %v2268_v58, %v1971_v59  ;;  %v260_v58 = vperm.slane %v2521_v38, 3 }
  0x43   :  { %1148 = vmatpush.bf16.msra.mxu3 %v2070_v14  ;;  %v1830_v36 = vor.u32 %v2232_v33, %v1827_v34  ;;  %v1690_v63 = vor.u32 %v2199_v55, %v1689_v54  ;;  %v1625_v33 = vld [vmem:[#allocation2 + $0x68] sm:$0xf]  ;;  %v2183_v34 = vld [vmem:[#allocation2 + $0x74] sm:$0xf0] }
  0x44   :  { %1112 = vmatpush.bf16.msra.mxu0 %v1638_v15  ;;  %v2204_v15 = vld [vmem:[#allocation2 + $0x124] sm:$0xf] }
  0x45   :  { %v1718_v25 = vor.u32 %v2204_v15, %v1715_v16  ;;  %v259_v15 = vperm.slane %v2521_v38, 2  ;;  %v2251_v38 = vld [vmem:[#allocation2 + $0x294] sm:$0xf0] }
  0x46   :  { %1125 = vmatpush.bf16.msrb.mxu1 %v1766_v45  ;;  %1138 = vmatpush.bf16.msrb.mxu2 %v1894_v2  ;;  %v2195_v2 = vld [vmem:[#allocation2 + $0xd4] sm:$0xf0] }
  0x47   :  { %1149 = vmatpush.bf16.msra.mxu3 %v2054_v22 }
  0x48   :  { %1113 = vmatpush.bf16.msra.mxu0 %v1622_v27  ;;  %v2236_v27 = vld [vmem:[#allocation2 + $0x224] sm:$0xf] }
  0x49   :  { %v1846_v30 = vor.u32 %v2236_v27, %v1843_v28  ;;  %v1818_v27 = vor.u32 %v2231_v19, %v1817_v18 }
  0x4a   :  { %1126 = vmatpush.bf16.msrb.mxu1 %v1750_v57  ;;  %1139 = vmatpush.bf16.msrb.mxu2 %v1878_v12  ;;  %v1657_v12 = vld [vmem:[#allocation2 + $0xa8] sm:$0xf] }
  0x4b   :  { %1150 = vmatpush.bf16.msra.mxu3 %v2038_v32  ;;  %v1658_v17 = vor.u32 %v2191_v13, %v1657_v12  ;;  %v2227_v32 = vld [vmem:[#allocation2 + $0x1d4] sm:$0xf0]  ;;  %v1691_v12 = vld [vmem:[#allocation2 + $0xf8] sm:$0xf0] }
  0x4c   :  { %1114 = vmatpush.bf16.msra.mxu0 %v1606_v40  ;;  %v1802_v41 = vor.u32 %v2227_v32, %v1801_v31  ;;  %v1721_v31 = vld [vmem:[#allocation2 + $0x128] sm:$0xf]  ;;  %v2207_v32 = vld [vmem:[#allocation2 + $0x134] sm:$0xf0] }
  0x4e   :  { %1127 = vmatpush.bf16.msrb.mxu1 %v1734_v5  ;;  %1140 = vmatpush.bf16.msrb.mxu2 %v1862_v20  ;;  %v1955_v5 = vld [vmem:[#allocation2 + $0x310] sm:$0xf0]  ;;  %v1641_v20 = vld [vmem:[#allocation2 + $0x88] sm:$0xf] }
  0x4f   :  { %1151 = vmatpush.bf16.msra.mxu3 %v2022_v39  ;;  %v1958_v8 = vor.u32 %v2264_v4, %v1955_v5  ;;  %v1945_v39 = vld [vmem:[#allocation2 + $0x2e8] sm:$0xf]  ;;  %v2215_v4 = vld [vmem:[#allocation2 + $0x174] sm:$0xf0] }
  0x50   :  { %1115 = vmatpush.bf16.msra.mxu0 %v1590_v52 }
  0x52   :  { %1128 = vmatpush.bf16.msrb.mxu1 %v1718_v25  ;;  %1141 = vmatpush.bf16.msrb.mxu2 %v1846_v30  ;;  %v1642_v30 = vor.u32 %v2187_v21, %v1641_v20  ;;  %v1881_v21 = vld [vmem:[#allocation2 + $0x268] sm:$0xf] }
  0x53   :  { %1152 = vmatpush.bf16.msra.mxu3 %v2006_v44  ;;  %v1785_v44 = vld [vmem:[#allocation2 + $0x1a8] sm:$0xf] }
  0x54   :  { %1116 = vmatpush.bf16.msra.mxu0 %v1574_v0  ;;  %v1673_v0 = vld [vmem:[#allocation2 + $0xc8] sm:$0xf] }
  0x55   :  { %v1674_v10 = vor.u32 %v2195_v2, %v1673_v0 }
  0x56   :  { %1129 = vmatpush.bf16.msrb.mxu1 %v1702_v26  ;;  %1142 = vmatpush.bf16.msrb.mxu2 %v1830_v36 }
  0x57   :  { %1153 = vmatpush.bf16.msra.mxu3 %v1990_v50 }
  0x5b   :  { %1154 = vmatpush.bf16.msra.mxu3 %v1974_v61  ;;  %v2175_v61 = vld [vmem:[#allocation2 + $0x34] sm:$0xf0] }
  0x5f   :  { %1155 = vmatpush.bf16.msra.mxu3 %v1958_v8  ;;  %v2171_v8 = vld [vmem:[#allocation2 + $0x14] sm:$0xf0] }
  0x8e   :  { %v173_v40 = vpop.f32.mrf.mxu1 }
  0x8f   :  { %v266_v6 = vadd.f32 %v258_v60, %v173_v40  ;;  %v2263_v40 = vld [vmem:[#allocation2 + $0x2f4] sm:$0xf0] }
  0x90   :  { %v1946_v46 = vor.u32 %v2263_v40, %v1945_v39  ;;  %v2243_v40 = vld [vmem:[#allocation2 + $0x254] sm:$0xf0] }
  0x91   :  { %v270_v14 = vmax.f32 %v266_v6, 0.0 }
  0x93   :  { %v160_v48 = vpop.f32.mrf.mxu3 }
  0x94   :  { %v212_v45 = vpop.f32.mrf.mxu0  ;;  %v265_v51 = vadd.f32 %v257_v43, %v160_v48  ;;  %v2179_v48 = vld [vmem:[#allocation2 + $0x54] sm:$0xf0] }
  0x95   :  { %v273_v49 = vadd.f32 %v257_v43, %v212_v45  ;;  %v1626_v43 = vor.u32 %v2183_v34, %v1625_v33  ;;  %v2223_v45 = vld [vmem:[#allocation2 + $0x1b4] sm:$0xf0]  ;;  %v1610_v55 = vor.u32 %v2179_v48, %v1609_v47 }
  0x96   :  { %v186_v52 = vpop.f32.mrf.mxu2  ;;  %v269_v56 = vmax.f32 %v265_v51, 0.0  ;;  %v175_v57 = vpop.f32.mrf.mxu1  ;;  %v1929_v51 = vld [vmem:[#allocation2 + $0x2c8] sm:$0xf]  ;;  %v2203_v47 = vld [vmem:[#allocation2 + $0x114] sm:$0xf0] }
  0x97   :  { %v277_v53 = vmax.f32 %v273_v49, 0.0  ;;  %v267_v22 = vadd.f32 %v259_v15, %v186_v52  ;;  %v2259_v52 = vld [vmem:[#allocation2 + $0x2d4] sm:$0xf0] }
  0x98   :  { %v2219_v57 = vld [vmem:[#allocation2 + $0x194] sm:$0xf0]  ;;  %v1930_v59 = vor.u32 %v2259_v52, %v1929_v51  ;;  %v2229_v51 = vld [vmem:[#allocation2 + $0x1ec] sm:$0xf]  ;;  %v1819_v52 = vld [vmem:[#allocation2 + $0x1f8] sm:$0xf0] }
  0x99   :  { %v281_v62 = vmax.f32 %v269_v56, %v277_v53  ;;  %v271_v36 = vmax.f32 %v267_v22, 0.0  ;;  %v1786_v53 = vor.u32 %v2223_v45, %v1785_v44  ;;  %v1769_v56 = vld [vmem:[#allocation2 + $0x188] sm:$0xf]  ;;  %v2247_v22 = vld [vmem:[#allocation2 + $0x274] sm:$0xf0] }
  0x9a   :  { %v1770_v0 = vor.u32 %v2219_v57, %v1769_v56  ;;  %v1882_v34 = vor.u32 %v2247_v22, %v1881_v21  ;;  %v2189_v44 = vld [vmem:[#allocation2 + $0xac] sm:$0xf]  ;;  %v1659_v45 = vld [vmem:[#allocation2 + $0xb8] sm:$0xf0]  ;;  %v2041_v56 = vld [vmem:[#allocation2 + $0x3a8] sm:$0xf] }
  0x9b   :  { %v2525_v1 = vpack.c.bf16 %v281_v62, %v281_v62  ;;  %v162_v7 = vpop.f32.mrf.mxu3  ;;  %v1913_v62 = vld [vmem:[#allocation2 + $0x2a8] sm:$0xf]  ;;  %v2287_v57 = vld [vmem:[#allocation2 + $0x3b4] sm:$0xf0]  ;;  %v2257_v21 = vld [vmem:[#allocation2 + $0x2cc] sm:$0xf] }
  0x9c   :  { %v214_v3 = vpop.f32.mrf.mxu0  ;;  %v1577_v7 = vld [vmem:[#allocation2 + $0x8] sm:$0xf]  ;;  %v1931_v22 = vld [vmem:[#allocation2 + $0x2d8] sm:$0xf0] }
  0x9d   :  { %1065 = vmatmul.bf16.vlgmr.msrb.gmra.mxu0 %v2525_v1  ;;  %v1753_v3 = vld [vmem:[#allocation2 + $0x168] sm:$0xf] }
  0x9e   :  { %v188_v9 = vpop.f32.mrf.mxu2  ;;  %1161 = vmatpush.bf16.msrb.mxu0 %v1690_v63  ;;  %v225_v11 = vpop.f32.mrf.mxu1  ;;  %v2255_v63 = vld [vmem:[#allocation2 + $0x2b4] sm:$0xf0] }
  0x9f   :  { %v274_v16 = vadd.f32 %v258_v60, %v225_v11  ;;  %v1593_v60 = vld [vmem:[#allocation2 + $0x28] sm:$0xf]  ;;  %v1914_v6 = vor.u32 %v2255_v63, %v1913_v62  ;;  %v2197_v11 = vld [vmem:[#allocation2 + $0xec] sm:$0xf] }
  0xa0   :  { %v1594_v2 = vor.u32 %v2175_v61, %v1593_v60  ;;  %v1897_v9 = vld [vmem:[#allocation2 + $0x288] sm:$0xf]  ;;  %v1694_v20 = vor.u32 %v2197_v11, %v1691_v12  ;;  %v1643_v60 = vld [vmem:[#allocation2 + $0x98] sm:$0xf0]  ;;  %v1822_v61 = vor.u32 %v2229_v51, %v1819_v52  ;;  %v2225_v62 = vld [vmem:[#allocation2 + $0x1cc] sm:$0xf] }
  0xa1   :  { %v278_v25 = vmax.f32 %v274_v16, 0.0  ;;  %v1737_v16 = vld [vmem:[#allocation2 + $0x148] sm:$0xf]  ;;  %v1898_v19 = vor.u32 %v2251_v38, %v1897_v9  ;;  %v1627_v9 = vld [vmem:[#allocation2 + $0x78] sm:$0xf0] }
  0xa2   :  { %1162 = vmatpush.bf16.msrb.mxu0 %v1674_v10  ;;  %v1947_v38 = vld [vmem:[#allocation2 + $0x2f8] sm:$0xf0] }
  0xa3   :  { %v282_v23 = vmax.f32 %v270_v14, %v278_v25  ;;  %v199_v24 = vpop.f32.mrf.mxu3  ;;  %v1754_v14 = vor.u32 %v2215_v4, %v1753_v3  ;;  %v2211_v25 = vld [vmem:[#allocation2 + $0x154] sm:$0xf0]  ;;  %v1833_v3 = vld [vmem:[#allocation2 + $0x208] sm:$0xf]  ;;  %v1899_v51 = vld [vmem:[#allocation2 + $0x298] sm:$0xf0] }
  0xa4   :  { %v268_v5 = vadd.f32 %v260_v58, %v199_v24  ;;  %v2295_v24 = vld [vmem:[#allocation2 + $0x3f4] sm:$0xf0] }
  0xa5   :  { %v2529_v28 = vpack.c.bf16 %v282_v23, %v282_v23  ;;  %v2073_v23 = vld [vmem:[#allocation2 + $0x3e8] sm:$0xf]  ;;  %v2235_v4 = vld [vmem:[#allocation2 + $0x214] sm:$0xf0] }
  0xa6   :  { %v238_v26 = vpop.f32.mrf.mxu2  ;;  %1163 = vmatpush.bf16.msrb.mxu0 %v1658_v17  ;;  %v227_v35 = vpop.f32.mrf.mxu1  ;;  %v272_v17 = vmax.f32 %v268_v5, 0.0  ;;  %v1834_v12 = vor.u32 %v2235_v4, %v1833_v3  ;;  %v2205_v3 = vld [vmem:[#allocation2 + $0x12c] sm:$0xf]  ;;  %v1723_v4 = vld [vmem:[#allocation2 + $0x138] sm:$0xf0] }
  0xa7   :  { %v275_v29 = vadd.f32 %v259_v15, %v238_v26  ;;  %1078 = vmatmul.bf16.vlgmr.msra.gmra.mxu1 %v2529_v28  ;;  %v1578_v15 = vor.u32 %v2171_v8, %v1577_v7  ;;  %v2074_v35 = vor.u32 %v2295_v24, %v2073_v23  ;;  %v2283_v7 = vld [vmem:[#allocation2 + $0x394] sm:$0xf0]  ;;  %v2181_v8 = vld [vmem:[#allocation2 + $0x6c] sm:$0xf] }
  0xa8   :  { %1174 = vmatpush.bf16.msra.mxu1 %v1818_v27  ;;  %v1738_v27 = vor.u32 %v2211_v25, %v1737_v16  ;;  %v1630_v16 = vor.u32 %v2181_v8, %v1627_v9  ;;  %v1867_v8 = vld [vmem:[#allocation2 + $0x258] sm:$0xf0]  ;;  %v2289_v9 = vld [vmem:[#allocation2 + $0x3cc] sm:$0xf] }
  0xa9   :  { %v279_v37 = vmax.f32 %v275_v29, 0.0  ;;  %v2193_v29 = vld [vmem:[#allocation2 + $0xcc] sm:$0xf] }
  0xaa   :  { %1164 = vmatpush.bf16.msrb.mxu0 %v1642_v30  ;;  %v1675_v30 = vld [vmem:[#allocation2 + $0xd8] sm:$0xf0] }
  0xab   :  { %v283_v42 = vmax.f32 %v271_v36, %v279_v37  ;;  %v201_v50 = vpop.f32.mrf.mxu3  ;;  %v1865_v36 = vld [vmem:[#allocation2 + $0x248] sm:$0xf]  ;;  %v1678_v39 = vor.u32 %v2193_v29, %v1675_v30  ;;  %v1934_v30 = vor.u32 %v2257_v21, %v1931_v22  ;;  %v2233_v21 = vld [vmem:[#allocation2 + $0x20c] sm:$0xf] }
  0xac   :  { %1175 = vmatpush.bf16.msra.mxu1 %v1802_v41  ;;  %v2057_v41 = vld [vmem:[#allocation2 + $0x3c8] sm:$0xf]  ;;  %v1866_v48 = vor.u32 %v2243_v40, %v1865_v36  ;;  %v2253_v36 = vld [vmem:[#allocation2 + $0x2ac] sm:$0xf] }
  0xad   :  { %v2532_v49 = vpack.c.bf16 %v283_v42, %v283_v42  ;;  %1117 = vmatmul.bf16.vlgmr.msra.gmra.mxu0 %v2525_v1  ;;  %v2291_v42 = vld [vmem:[#allocation2 + $0x3d4] sm:$0xf0]  ;;  %v2281_v22 = vld [vmem:[#allocation2 + $0x38c] sm:$0xf] }
  0xae   :  { %v240_v54 = vpop.f32.mrf.mxu2  ;;  %1165 = vmatpush.bf16.msrb.mxu0 %v1626_v43  ;;  %v1722_v43 = vor.u32 %v2207_v32, %v1721_v31  ;;  %v2058_v50 = vor.u32 %v2291_v42, %v2057_v41  ;;  %v1993_v31 = vld [vmem:[#allocation2 + $0x348] sm:$0xf]  ;;  %v2275_v32 = vld [vmem:[#allocation2 + $0x354] sm:$0xf0]  ;;  %v2213_v41 = vld [vmem:[#allocation2 + $0x16c] sm:$0xf] }
  0xaf   :  { %1091 = vmatmul.bf16.vlgmr.msra.gmra.mxu2 %v2532_v49  ;;  %v1662_v54 = vor.u32 %v2189_v44, %v1659_v45  ;;  %v1994_v40 = vor.u32 %v2275_v32, %v1993_v31  ;;  %v1755_v42 = vld [vmem:[#allocation2 + $0x178] sm:$0xf0]  ;;  %v1977_v45 = vld [vmem:[#allocation2 + $0x328] sm:$0xf]  ;;  %v2273_v31 = vld [vmem:[#allocation2 + $0x34c] sm:$0xf] }
  0xb0   :  { %1187 = vmatpush.bf16.msra.mxu2 %v1946_v46  ;;  %1176 = vmatpush.bf16.msra.mxu1 %v1786_v53  ;;  %v1705_v46 = vld [vmem:[#allocation2 + $0x108] sm:$0xf]  ;;  %v1758_v52 = vor.u32 %v2213_v41, %v1755_v42  ;;  %v1995_v32 = vld [vmem:[#allocation2 + $0x358] sm:$0xf0] }
  0xb1   :  { %v1849_v53 = vld [vmem:[#allocation2 + $0x228] sm:$0xf] }
  0xb2   :  { %1166 = vmatpush.bf16.msrb.mxu0 %v1610_v55  ;;  %v2239_v55 = vld [vmem:[#allocation2 + $0x234] sm:$0xf0] }
  0xb3   :  { %v251_v10 = vpop.f32.mrf.mxu3  ;;  %v1850_v63 = vor.u32 %v2239_v55, %v1849_v53  ;;  %v1739_v55 = vld [vmem:[#allocation2 + $0x158] sm:$0xf0] }
  0xb4   :  { %1188 = vmatpush.bf16.msra.mxu2 %v1930_v59  ;;  %1177 = vmatpush.bf16.msra.mxu1 %v1770_v0  ;;  %v276_v13 = vadd.f32 %v260_v58, %v251_v10  ;;  %v1706_v58 = vor.u32 %v2203_v47, %v1705_v46  ;;  %v2185_v59 = vld [vmem:[#allocation2 + $0x8c] sm:$0xf]  ;;  %v2042_v0 = vor.u32 %v2287_v57, %v2041_v56  ;;  %v2271_v46 = vld [vmem:[#allocation2 + $0x334] sm:$0xf0] }
  0xb5   :  { %v1646_v5 = vor.u32 %v2185_v59, %v1643_v60  ;;  %v2261_v10 = vld [vmem:[#allocation2 + $0x2ec] sm:$0xf]  ;;  %v1978_v53 = vor.u32 %v2271_v46, %v1977_v45  ;;  %v2267_v59 = vld [vmem:[#allocation2 + $0x314] sm:$0xf0]  ;;  %v2302_v46 = vld [vmem:[%s2628_s5 + $0x30] sm:$0xff] }
  0xb6   :  { %1167 = vmatpush.bf16.msrb.mxu0 %v1594_v2  ;;  %v280_v18 = vmax.f32 %v276_v13, 0.0  ;;  %v1803_v2 = vld [vmem:[#allocation2 + $0x1d8] sm:$0xf0]  ;;  %v1950_v25 = vor.u32 %v2261_v10, %v1947_v38  ;;  %v2169_v47 = vld [vmem:[#allocation2 + $0xc] sm:$0xf]  ;;  %v1726_v38 = vor.u32 %v2205_v3, %v1723_v4  ;;  %v2310_v4 = vld [vmem:[%s2628_s5 + $0x70] sm:$0xff] }
  0xb7   :  { %1130 = vmatmul.bf16.vlgmr.msrb.gmra.mxu1 %v2529_v28  ;;  %v1806_v11 = vor.u32 %v2225_v62, %v1803_v2  ;;  %v2245_v60 = vld [vmem:[#allocation2 + $0x26c] sm:$0xf]  ;;  %v2059_v10 = vld [vmem:[#allocation2 + $0x3d8] sm:$0xf0] }
  0xb8   :  { %1189 = vmatpush.bf16.msra.mxu2 %v1914_v6  ;;  %v284_v26 = vmax.f32 %v272_v17, %v280_v18  ;;  %1178 = vmatpush.bf16.msra.mxu1 %v1754_v14  ;;  %v2025_v6 = vld [vmem:[#allocation2 + $0x388] sm:$0xf]  ;;  %v2221_v14 = vld [vmem:[#allocation2 + $0x1ac] sm:$0xf]  ;;  %v2279_v18 = vld [vmem:[#allocation2 + $0x374] sm:$0xf0] }
  0xb9   :  { %v2026_v13 = vor.u32 %v2283_v7, %v2025_v6  ;;  %v2009_v17 = vld [vmem:[#allocation2 + $0x368] sm:$0xf]  ;;  %v2293_v62 = vld [vmem:[#allocation2 + $0x3ec] sm:$0xf] }
  0xba   :  { %1168 = vmatpush.bf16.msrb.mxu0 %v1578_v15  ;;  %v2538_v33 = vpack.c.bf16 %v284_v26, %v284_v26  ;;  %v1787_v15 = vld [vmem:[#allocation2 + $0x1b8] sm:$0xf0]  ;;  %v2010_v24 = vor.u32 %v2279_v18, %v2009_v17  ;;  %v2217_v26 = vld [vmem:[#allocation2 + $0x18c] sm:$0xf] }
  0xbb   :  { %v253_v37 = vpop.f32.mrf.mxu3  ;;  %v1790_v23 = vor.u32 %v2221_v14, %v1787_v15  ;;  %v2241_v7 = vld [vmem:[#allocation2 + $0x24c] sm:$0xf]  ;;  %v2062_v14 = vor.u32 %v2289_v9, %v2059_v10  ;;  %v2043_v17 = vld [vmem:[#allocation2 + $0x3b8] sm:$0xf0]  ;;  %v2308_v9 = vld [vmem:[%s2628_s5 + $0x60] sm:$0xff] }
  0xbc   :  { %1190 = vmatpush.bf16.msra.mxu2 %v1898_v19  ;;  %1179 = vmatpush.bf16.msra.mxu1 %v1738_v27  ;;  %v2177_v19 = vld [vmem:[#allocation2 + $0x4c] sm:$0xf]  ;;  %v1771_v27 = vld [vmem:[#allocation2 + $0x198] sm:$0xf0] }
  0xbd   :  { %1104 = vmatmul.bf16.vlgmr.msrb.gmra.mxu3 %v2538_v33  ;;  %1169 = vmatmul.bf16.vlgmr.msrb.gmra.mxu0 %v2525_v1  ;;  %v1915_v37 = vld [vmem:[#allocation2 + $0x2b8] sm:$0xf0]  ;;  %v2237_v15 = vld [vmem:[#allocation2 + $0x22c] sm:$0xf] }
  0xbe   :  { %1213 = vmatpush.bf16.msra.mxu0 %v1694_v20  ;;  %1200 = vmatpush.bf16.msrb.mxu3 %v2074_v35  ;;  %v1611_v20 = vld [vmem:[#allocation2 + $0x58] sm:$0xf0]  ;;  %v1918_v44 = vor.u32 %v2253_v36, %v1915_v37 }
  0xbf   :  { %1143 = vmatmul.bf16.vlgmr.msrb.gmra.mxu2 %v2532_v49  ;;  %v1614_v29 = vor.u32 %v2177_v19, %v1611_v20  ;;  %v1595_v35 = vld [vmem:[#allocation2 + $0x38] sm:$0xf0] }
  0xc0   :  { %1191 = vmatpush.bf16.msra.mxu2 %v1882_v34  ;;  %1180 = vmatpush.bf16.msra.mxu1 %v1722_v43  ;;  %v2173_v34 = vld [vmem:[#allocation2 + $0x2c] sm:$0xf]  ;;  %v1979_v36 = vld [vmem:[#allocation2 + $0x338] sm:$0xf0] }
  0xc1   :  { %v1598_v43 = vor.u32 %v2173_v34, %v1595_v35  ;;  %v1998_v34 = vor.u32 %v2273_v31, %v1995_v32  ;;  %v2269_v35 = vld [vmem:[#allocation2 + $0x32c] sm:$0xf]  ;;  %v2307_v10 = vld [vmem:[%s2628_s5 + $0x58] sm:$0xff] }
  0xc2   :  { %1214 = vmatpush.bf16.msra.mxu0 %v1678_v39  ;;  %1201 = vmatpush.bf16.msrb.mxu3 %v2058_v50  ;;  %v1774_v39 = vor.u32 %v2217_v26, %v1771_v27  ;;  %v2249_v50 = vld [vmem:[#allocation2 + $0x28c] sm:$0xf]  ;;  %v1982_v37 = vor.u32 %v2269_v35, %v1979_v36 }
  0xc3   :  { %v1902_v57 = vor.u32 %v2249_v50, %v1899_v51  ;;  %v2277_v27 = vld [vmem:[#allocation2 + $0x36c] sm:$0xf] }
  0xc4   :  { %1192 = vmatpush.bf16.msra.mxu2 %v1866_v48  ;;  %1181 = vmatpush.bf16.msra.mxu1 %v1706_v58  ;;  %v1579_v48 = vld [vmem:[#allocation2 + $0x18] sm:$0xf0]  ;;  %v1961_v58 = vld [vmem:[#allocation2 + $0x308] sm:$0xf] }
  0xc5   :  { %v1582_v56 = vor.u32 %v2169_v47, %v1579_v48  ;;  %v1962_v2 = vor.u32 %v2267_v59, %v1961_v58  ;;  %v2298_v58 = vld [vmem:[%s2628_s5 + $0x10] sm:$0xff] }
  0xc6   :  { %1215 = vmatpush.bf16.msra.mxu0 %v1662_v54  ;;  %1202 = vmatpush.bf16.msrb.mxu3 %v2042_v0  ;;  %v2209_v54 = vld [vmem:[#allocation2 + $0x14c] sm:$0xf] }
  0xc7   :  { %1182 = vmatmul.bf16.vlgmr.msra.gmra.mxu1 %v2529_v28  ;;  %v1742_v0 = vor.u32 %v2209_v54, %v1739_v55  ;;  %v2299_v54 = vld [vmem:[%s2628_s5 + $0x18] sm:$0xff] }
  0xc8   :  { %1226 = vmatpush.bf16.msrb.mxu1 %v1822_v61  ;;  %1193 = vmatpush.bf16.msra.mxu2 %v1850_v63  ;;  %v1883_v61 = vld [vmem:[#allocation2 + $0x278] sm:$0xf0] }
  0xc9   :  { %v2075_v63 = vld [vmem:[#allocation2 + $0x3f8] sm:$0xf0] }
  0xca   :  { %1216 = vmatpush.bf16.msra.mxu0 %v1646_v5  ;;  %1203 = vmatpush.bf16.msrb.mxu3 %v2026_v13  ;;  %v1886_v5 = vor.u32 %v2245_v60, %v1883_v61  ;;  %v2078_v6 = vor.u32 %v2293_v62, %v2075_v63  ;;  %v1870_v13 = vor.u32 %v2241_v7, %v1867_v8  ;;  %v2297_v61 = vld [vmem:[%s2628_s5 + $0x8] sm:$0xff] }
  0xcc   :  { %1227 = vmatpush.bf16.msrb.mxu1 %v1806_v11  ;;  %1194 = vmatpush.bf16.msra.mxu2 %v1834_v12  ;;  %v2201_v11 = vld [vmem:[#allocation2 + $0x10c] sm:$0xf]  ;;  %v1707_v12 = vld [vmem:[#allocation2 + $0x118] sm:$0xf0] }
  0xcd   :  { %1156 = vmatmul.bf16.vlgmr.msra.gmra.mxu3 %v2538_v33  ;;  %v1710_v18 = vor.u32 %v2201_v11, %v1707_v12 }
  0xce   :  { %1217 = vmatpush.bf16.msra.mxu0 %v1630_v16  ;;  %1204 = vmatpush.bf16.msrb.mxu3 %v2010_v24  ;;  %v1851_v16 = vld [vmem:[#allocation2 + $0x238] sm:$0xf0] }
  0xcf   :  { %1195 = vmatmul.bf16.vlgmr.msra.gmra.mxu2 %v2532_v49  ;;  %v1854_v19 = vor.u32 %v2237_v15, %v1851_v16  ;;  %v2306_v16 = vld [vmem:[%s2628_s5 + $0x50] sm:$0xff] }
  0xd0   :  { %1239 = vmatpush.bf16.msrb.mxu2 %v1950_v25  ;;  %1228 = vmatpush.bf16.msrb.mxu1 %v1790_v23  ;;  %v2285_v25 = vld [vmem:[#allocation2 + $0x3ac] sm:$0xf]  ;;  %v2027_v23 = vld [vmem:[#allocation2 + $0x398] sm:$0xf0] }
  0xd1   :  { %v2046_v20 = vor.u32 %v2285_v25, %v2043_v17  ;;  %v2030_v26 = vor.u32 %v2281_v22, %v2027_v23 }
  0xd2   :  { %1218 = vmatpush.bf16.msra.mxu0 %v1614_v29  ;;  %1205 = vmatpush.bf16.msrb.mxu3 %v1994_v40  ;;  %v2011_v29 = vld [vmem:[#allocation2 + $0x378] sm:$0xf0] }
  0xd3   :  { %v1963_v40 = vld [vmem:[#allocation2 + $0x318] sm:$0xf0] }
  0xd4   :  { %1240 = vmatpush.bf16.msrb.mxu2 %v1934_v30  ;;  %1229 = vmatpush.bf16.msrb.mxu1 %v1774_v39  ;;  %v2014_v30 = vor.u32 %v2277_v27, %v2011_v29  ;;  %v2265_v39 = vld [vmem:[#allocation2 + $0x30c] sm:$0xf]  ;;  %v2304_v27 = vld [vmem:[%s2628_s5 + $0x40] sm:$0xff] }
  0xd5   :  { %v1966_v41 = vor.u32 %v2265_v39, %v1963_v40 }
  0xd6   :  { %1219 = vmatpush.bf16.msra.mxu0 %v1598_v43  ;;  %1206 = vmatpush.bf16.msrb.mxu3 %v1978_v53 }
  0xd8   :  { %1241 = vmatpush.bf16.msrb.mxu2 %v1918_v44  ;;  %1230 = vmatpush.bf16.msrb.mxu1 %v1758_v52  ;;  %v2300_v52 = vld [vmem:[%s2628_s5 + $0x20] sm:$0xff] }
  0xda   :  { %1220 = vmatpush.bf16.msra.mxu0 %v1582_v56  ;;  %1207 = vmatpush.bf16.msrb.mxu3 %v1962_v2  ;;  %v2311_v2 = vld [vmem:[%s2628_s5 + $0x78] sm:$0xff] }
  0xdc   :  { %1242 = vmatpush.bf16.msrb.mxu2 %v1902_v57  ;;  %1231 = vmatpush.bf16.msrb.mxu1 %v1742_v0  ;;  %v2296_v0 = vld [vmem:[%s2628_s5] sm:$0xff] }
  0xdd   :  { %1221 = vmatmul.bf16.vlgmr.msra.gmra.mxu0 %v2525_v1  ;;  %1208 = vmatmul.bf16.vlgmr.msrb.gmra.mxu3 %v2538_v33  ;;  %v1835_v1 = vld [vmem:[#allocation2 + $0x218] sm:$0xf0] }
  0xde   :  { %1252 = vmatpush.bf16.msra.mxu3 %v2078_v6  ;;  %v1838_v24 = vor.u32 %v2233_v21, %v1835_v1  ;;  %v2309_v6 = vld [vmem:[%s2628_s5 + $0x68] sm:$0xff] }
  0xdf   :  { %v2305_v21 = vld [vmem:[%s2628_s5 + $0x48] sm:$0xff] }
  0xe0   :  { %1243 = vmatpush.bf16.msrb.mxu2 %v1886_v5  ;;  %1232 = vmatpush.bf16.msrb.mxu1 %v1726_v38 }
  0xe2   :  { %1253 = vmatpush.bf16.msra.mxu3 %v2062_v14  ;;  %v1265_v14 = vld [vmem:[%s2627_s4] sm:$0x3] }
  0xe3   :  { %v1267_v17 = vperm.slane %v1265_v14, 0 }
  0xe4   :  { %1244 = vmatpush.bf16.msrb.mxu2 %v1870_v13  ;;  %1233 = vmatpush.bf16.msrb.mxu1 %v1710_v18 }
  0xe6   :  { %1254 = vmatpush.bf16.msra.mxu3 %v2046_v20 }
  0xe7   :  { %1234 = vmatmul.bf16.vlgmr.msrb.gmra.mxu1 %v2529_v28 }
  0xe8   :  { %1245 = vmatpush.bf16.msrb.mxu2 %v1854_v19  ;;  %1428 = vmatpush.bf16.msra.mxu1 %v2311_v2 }
  0xea   :  { %1255 = vmatpush.bf16.msra.mxu3 %v2030_v26 }
  0xec   :  { %1246 = vmatpush.bf16.msrb.mxu2 %v1838_v24  ;;  %1429 = vmatpush.bf16.msra.mxu1 %v2310_v4 }
  0xee   :  { %1256 = vmatpush.bf16.msra.mxu3 %v2014_v30 }
  0xef   :  { %1247 = vmatmul.bf16.vlgmr.msrb.gmra.mxu2 %v2532_v49  ;;  %v2303_v49 = vld [vmem:[%s2628_s5 + $0x38] sm:$0xff] }
  0xf0   :  { %1415 = vmatpush.bf16.msrb.mxu0 %v2303_v49  ;;  %1430 = vmatpush.bf16.msra.mxu1 %v2309_v6 }
  0xf2   :  { %1257 = vmatpush.bf16.msra.mxu3 %v1998_v34 }
  0xf4   :  { %1416 = vmatpush.bf16.msrb.mxu0 %v2302_v46  ;;  %1431 = vmatpush.bf16.msra.mxu1 %v2308_v9 }
  0xf6   :  { %1258 = vmatpush.bf16.msra.mxu3 %v1982_v37 }
  0xf8   :  { %1432 = vmatpush.bf16.msra.mxu1 %v2307_v10 }
  0xfa   :  { %1259 = vmatpush.bf16.msra.mxu3 %v1966_v41  ;;  %v1268_v41 = vperm.slane %v1265_v14, 1 }
  0xfc   :  { %1433 = vmatpush.bf16.msra.mxu1 %v2306_v16 }
  0xfd   :  { %1260 = vmatmul.bf16.vlgmr.msra.gmra.mxu3 %v2538_v33  ;;  %v2301_v33 = vld [vmem:[%s2628_s5 + $0x28] sm:$0xff] }
  0xfe   :  { %1417 = vmatpush.bf16.msrb.mxu0 %v2301_v33 }
 0x100   :  { %1434 = vmatpush.bf16.msra.mxu1 %v2305_v21 }
 0x102   :  { %1418 = vmatpush.bf16.msrb.mxu0 %v2300_v52  ;;  %v1447_v52 = vld [vmem:[%s2630_s7 + $0x10] sm:$0xf] }
 0x104   :  { %1435 = vmatpush.bf16.msra.mxu1 %v2304_v27 }
 0x106   :  { %1419 = vmatpush.bf16.msrb.mxu0 %v2299_v54 }
 0x10a   :  { %1420 = vmatpush.bf16.msrb.mxu0 %v2298_v58 }
 0x10e   :  { %1421 = vmatpush.bf16.msrb.mxu0 %v2297_v61 }
 0x112   :  { %1422 = vmatpush.bf16.msrb.mxu0 %v2296_v0 }
 0x11a   :  { %v1066_v28 = vpop.f32.mrf.mxu0 }
 0x122   :  { %v1068_v42 = vpop.f32.mrf.mxu0 }
 0x124   :  { %v1079_v43 = vpop.f32.mrf.mxu1 }
 0x125   :  { %v1080_v13 = vadd.f32 %v1079_v43, %v1066_v28 }
 0x12a   :  { %v1118_v44 = vpop.f32.mrf.mxu0 }
 0x12c   :  { %v1081_v45 = vpop.f32.mrf.mxu1 }
 0x132   :  { %v1092_v47 = vpop.f32.mrf.mxu2  ;;  %v1120_v48 = vpop.f32.mrf.mxu0 }
 0x133   :  { %v1093_v15 = vadd.f32 %v1092_v47, %v1080_v13 }
 0x134   :  { %v1131_v50 = vpop.f32.mrf.mxu1 }
 0x135   :  { %v2560_v51 = vadd.f32 %v1131_v50, %v1118_v44 }
 0x13a   :  { %v1094_v53 = vpop.f32.mrf.mxu2  ;;  %v1170_v55 = vpop.f32.mrf.mxu0 }
 0x13b   :  { %v1461_v53 = vunpack.c.l.b16 %v1447_v52 }
 0x13c   :  { %v1133_v56 = vpop.f32.mrf.mxu1 }
 0x13d   :  { %v2312_v56 = vld [vmem:[%s2630_s7] sm:$0xff] }
 0x140   :  { %v1105_v57 = vpop.f32.mrf.mxu3 }
 0x141   :  { %v1106_v25 = vadd.f32 %v1105_v57, %v1093_v15 }
 0x142   :  { %v1144_v59 = vpop.f32.mrf.mxu2  ;;  %v1172_v60 = vpop.f32.mrf.mxu0 }
 0x143   :  { %v1271_v22 = vadd.f32 %v1267_v17, %v1106_v25  ;;  %v1145_v39 = vadd.f32 %v1144_v59, %v2560_v51  ;;  %v1464_v51 = vpack.c.b16 %v1461_v53, %v1461_v53  ;;  %v2317_v59 = vld [vmem:[%s2629_s6] ss:$0 sm:$0xff] }
 0x144   :  { %v1183_v62 = vpop.f32.mrf.mxu1 }
 0x145   :  { %v1184_v18 = vadd.f32 %v1183_v62, %v1170_v55  ;;  %v1273_v29 = vmax.f32 %v1271_v22, 0.0  ;;  %v1473_v54 = vsel %vm1471_vm1, %v1464_v51, 0  ;;  %v2313_v55 = vld [vmem:[%s2630_s7 + $0x8] sm:$0xff] }
 0x146   :  { %1480 = vmatpush.bf16.msra.mxu2 %v1473_v54 }
 0x148   :  { %v1107_v63 = vpop.f32.mrf.mxu3 }
 0x14a   :  { %v1146_v3 = vpop.f32.mrf.mxu2  ;;  %1481 = vmatpush.bf16.msra.mxu2 %v2313_v55 }
 0x14b   :  { %v2318_v3 = vld [vmem:[%s2631_s8] ss:$0 sm:$0xff] }
 0x14c   :  { %v1185_v5 = vpop.f32.mrf.mxu1 }
 0x14e   :  { %1482 = vmatpush.bf16.msra.mxu2 %v2312_v56 }
 0x150   :  { %v1157_v7 = vpop.f32.mrf.mxu3 }
 0x151   :  { %v1158_v40 = vadd.f32 %v1157_v7, %v1145_v39 }
 0x152   :  { %v1196_v8 = vpop.f32.mrf.mxu2 }
 0x153   :  { %v1197_v19 = vadd.f32 %v1196_v8, %v1184_v18  ;;  %v1272_v44 = vadd.f32 %v1268_v41, %v1158_v40 }
 0x155   :  { %v1274_v46 = vmax.f32 %v1272_v44, 0.0 }
 0x158   :  { %v1159_v11 = vpop.f32.mrf.mxu3 }
 0x15a   :  { %v1222_v38 = vpop.f32.mrf.mxu0  ;;  %v1198_v12 = vpop.f32.mrf.mxu2 }
 0x160   :  { %v1209_v1 = vpop.f32.mrf.mxu3 }
 0x161   :  { %v1210_v23 = vadd.f32 %v1209_v1, %v1197_v19 }
 0x162   :  { %v1224_v20 = vpop.f32.mrf.mxu0 }
 0x163   :  { %v1275_v26 = vadd.f32 %v1267_v17, %v1210_v23 }
 0x164   :  { %v1235_v24 = vpop.f32.mrf.mxu1 }
 0x165   :  { %v1277_v30 = vmax.f32 %v1275_v26, 0.0  ;;  %v1236_v28 = vadd.f32 %v1235_v24, %v1222_v38 }
 0x167   :  { %v1279_v31 = vmax.f32 %v1273_v29, %v1277_v30 }
 0x168   :  { %v1211_v32 = vpop.f32.mrf.mxu3 }
 0x169   :  { %v1281_v34 = vpack.c.bf16 %v1279_v31, %v1279_v31 }
 0x16b   :  { %1423 = vmatmul.bf16.vlgmr.msrb.gmra.mxu0 %v1281_v34 }
 0x16c   :  { %v1237_v35 = vpop.f32.mrf.mxu1 }
 0x172   :  { %v1248_v36 = vpop.f32.mrf.mxu2 }
 0x173   :  { %v1249_v42 = vadd.f32 %v1248_v36, %v1236_v28 }
 0x17a   :  { %v1250_v37 = vpop.f32.mrf.mxu2 }
 0x180   :  { %v1261_v43 = vpop.f32.mrf.mxu3 }
 0x181   :  { %v1262_v49 = vadd.f32 %v1261_v43, %v1249_v42 }
 0x183   :  { %v1276_v45 = vadd.f32 %v1268_v41, %v1262_v49 }
 0x185   :  { %v1278_v47 = vmax.f32 %v1276_v45, 0.0 }
 0x187   :  { %v1280_v48 = vmax.f32 %v1274_v46, %v1278_v47 }
 0x188   :  { %v1263_v33 = vpop.f32.mrf.mxu3 }
 0x189   :  { %v1282_v50 = vpack.c.bf16 %v1280_v48, %v1280_v48 }
 0x18b   :  { %1436 = vmatmul.bf16.vlgmr.msra.gmra.mxu1 %v1282_v50 }
 0x1e8   :  { %v1424_v57 = vpop.f32.mrf.mxu0 }
 0x1e9   :  { %v1425_v60 = vadd.f32 %v2317_v59, %v1424_v57 }
 0x1f0   :  { %v1426_v58 = vpop.f32.mrf.mxu0 }
 0x208   :  { %v1437_v61 = vpop.f32.mrf.mxu1 }
 0x209   :  { %v1438_v62 = vadd.f32 %v1437_v61, %v1425_v60 }
 0x20b   :  { %v1441_v63 = vmax.f32 %v1438_v62, 0.0 }
 0x20d   :  { %v1442_v0 = vpack.c.bf16 %v1441_v63, %v1441_v63 }
 0x20f   :  { %2151 = vmatmul.msk.bf16.vlgmr.msra.gmra.mxu2 %vm1467_vm2, %v1442_v0 }
 0x210   :  { %v1439_v2 = vpop.f32.mrf.mxu1 }
 0x292   :  { %v1484_v4 = vpop.f32.mrf.mxu2 }
 0x293   :  { %v1485_v5 = vadd.f32 %v2318_v3, %v1484_v4 }
 0x295   :  { %1489 = vst.msk [vmem:[%s2632_s9] sm:$0xff] %vm1488_vm3, %v1485_v5 }
 0x29a   :  { %v1486_v6 = vpop.f32.mrf.mxu2 }
 0x29b   :  { %1494 = vsyncpa [#allocation3], 1 }

</bundles_post_ra>
